<compile_context>
chip_gen: v6e
topology: v6e:2x2x1
jax: 0.10.0
libtpu: 0.0.40
codegen_flags: <defaults>
</compile_context>

<pallas_src>
import jax
import jax.numpy as jnp
from jax.experimental import pallas as pl
from jax.experimental.pallas import tpu as pltpu


def _round_up(x, m):
    return ((x + m - 1) // m) * m


def weight_pred_kernel(x_ref, w1_ref, t1_ref, w2_ref, t2_ref,
                       w3_ref, b3_ref, o_ref):
    # ---- fc1 (+ folded bn1 scale) + shift + relu --------------------------
    # x arrives as bf16 already (cast once in the wrapper).
    h1 = jnp.dot(x_ref[...], w1_ref[...], preferred_element_type=jnp.float32)
    h1 = jnp.maximum(h1 + t1_ref[...], 0.0).astype(jnp.bfloat16)
    # dropout(p=0.3): identity in eval mode

    # ---- fc2 (+ folded bn2 scale) + shift + relu --------------------------
    h2 = jnp.dot(h1, w2_ref[...], preferred_element_type=jnp.float32)
    h2 = jnp.maximum(h2 + t2_ref[...], 0.0).astype(jnp.bfloat16)
    # dropout(p=0.3): identity in eval mode

    # ---- fc3 + softmax(dim=1) over lane-padded (128) columns --------------
    logits = jnp.dot(h2, w3_ref[...], preferred_element_type=jnp.float32)
    logits = logits + b3_ref[...]            # padded cols biased to -1e30 (f32)
    m = jnp.max(logits, axis=1, keepdims=True)
    e = jnp.exp(logits - m)
    denom = jnp.sum(e, axis=1, keepdims=True)
    o_ref[...] = (e * pl.reciprocal(denom, approx=True)).astype(o_ref.dtype)


def prepare_params(params, num_weight):
    """One-time weight transformation (run OUTSIDE the hot path).

    Folds eval-mode BatchNorm1d into the Linear weights / shifts:
      bn(x@W.T + b) = x@(W.T * s) + ((b - mean) * s + beta),  s = gamma/sqrt(var+eps)
    Pre-transposes to [in, out], casts weights to bf16, pads fc3 to 128 lanes.
    """
    (w1, b1, g1, be1, m1, v1,
     w2, b2, g2, be2, m2, v2,
     w3, b3) = params
    eps = 1e-5

    s1 = g1 / jnp.sqrt(v1 + eps)
    t1 = (b1 - m1) * s1 + be1
    s2 = g2 / jnp.sqrt(v2 + eps)
    t2 = (b2 - m2) * s2 + be2

    w1p = (jnp.transpose(w1) * s1[None, :]).astype(jnp.bfloat16)   # (1024, 512)
    w2p = (jnp.transpose(w2) * s2[None, :]).astype(jnp.bfloat16)   # (512, 256)

    nw_pad = max(128, _round_up(num_weight, 128))
    w3p = jnp.zeros((256, nw_pad), jnp.bfloat16)
    w3p = w3p.at[:, :num_weight].set(jnp.transpose(w3).astype(jnp.bfloat16))
    # Padded logits get a huge negative bias so they contribute 0 to softmax.
    b3p = jnp.full((1, nw_pad), -1e30, dtype=jnp.float32)
    b3p = b3p.at[0, :num_weight].set(b3.astype(jnp.float32))

    return (w1p, t1.reshape(1, -1).astype(jnp.float32),
            w2p, t2.reshape(1, -1).astype(jnp.float32),
            w3p, b3p, num_weight, nw_pad)


def weight_pred_net(x, prepared, tile_b=512, out_dtype=jnp.bfloat16):
    """x: (B, 1024) f32 or bf16. Returns softmax weights (B, num_weight)."""
    w1p, t1, w2p, t2, w3p, b3p, num_weight, nw_pad = prepared
    B = x.shape[0]

    # Stream the input as bf16: halves HBM traffic on an HBM-bound kernel and
    # feeds the MXU directly.
    if x.dtype != jnp.bfloat16:
        x = x.astype(jnp.bfloat16)

    # Batch tile: multiple of 16 (bf16 sublane packing), capped at tile_b, and
    # chosen so the grid has >= 2 steps whenever B allows it (lets the
    # "parallel" batch axis shard across v7x's two TensorCores).
    tile_b = max(16, (tile_b // 16) * 16)
    tb = max(16, min(tile_b, _round_up(pl.cdiv(B, 2), 16)))
    grid = (pl.cdiv(B, tb),)
    # NOTE: no wrapper-side jnp.pad of x. The ragged last block is masked by
    # Pallas; out-of-bounds rows hold garbage but softmax is strictly row-wise
    # and their stores are dropped, so in-bounds rows are unaffected.

    out_itemsize = jnp.dtype(out_dtype).itemsize
    flops = 2 * B * (1024 * 512 + 512 * 256 + 256 * nw_pad)
    bytes_accessed = (B * 1024 * 2                                   # x (bf16)
                      + B * nw_pad * out_itemsize                    # output
                      + (1024 * 512 + 512 * 256 + 256 * nw_pad) * 2  # weights
                      + (512 + 256 + nw_pad) * 4)                    # shifts/bias
    cost = pl.CostEstimate(flops=flops,
                           transcendentals=B * (nw_pad + 1),
                           bytes_accessed=bytes_accessed)

    out = pl.pallas_call(
        weight_pred_kernel,
        out_shape=jax.ShapeDtypeStruct((B, nw_pad), out_dtype),
        grid=grid,
        in_specs=[
            pl.BlockSpec((tb, 1024), lambda i: (i, 0)),     # x tile (pipelined)
            pl.BlockSpec((1024, 512), lambda i: (0, 0)),    # w1 (VMEM-resident)
            pl.BlockSpec((1, 512), lambda i: (0, 0)),       # bn1 shift
            pl.BlockSpec((512, 256), lambda i: (0, 0)),     # w2
            pl.BlockSpec((1, 256), lambda i: (0, 0)),       # bn2 shift
            pl.BlockSpec((256, nw_pad), lambda i: (0, 0)),  # w3 (lane-padded)
            pl.BlockSpec((1, nw_pad), lambda i: (0, 0)),    # b3 (-1e30 padding)
        ],
        out_specs=pl.BlockSpec((tb, nw_pad), lambda i: (i, 0)),
        compiler_params=pltpu.CompilerParams(
            dimension_semantics=("parallel",),
            vmem_limit_bytes=32 * 1024 * 1024),
        cost_estimate=cost,
    )(x, w1p, t1, w2p, t2, w3p, b3p)

    return out[:, :num_weight]


def weight_pred_ref(x, params):
    """Pure-JAX f32 reference (eval-mode PyTorch semantics)."""
    (w1, b1, g1, be1, m1, v1,
     w2, b2, g2, be2, m2, v2,
     w3, b3) = params
    eps = 1e-5
    h1 = x @ w1.T + b1
    h1 = (h1 - m1) / jnp.sqrt(v1 + eps) * g1 + be1
    h1 = jnp.maximum(h1, 0.0)
    h2 = h1 @ w2.T + b2
    h2 = (h2 - m2) / jnp.sqrt(v2 + eps) * g2 + be2
    h2 = jnp.maximum(h2, 0.0)
    logits = h2 @ w3.T + b3
    return jax.nn.softmax(logits, axis=1)


def make_params(key, num_weight):
    ks = jax.random.split(key, 14)
    def rnd(k, shape, scale):
        return jax.random.normal(k, shape, dtype=jnp.float32) * scale
    w1 = rnd(ks[0], (512, 1024), 0.02)
    b1 = rnd(ks[1], (512,), 0.02)
    g1 = 1.0 + rnd(ks[2], (512,), 0.05)
    be1 = rnd(ks[3], (512,), 0.05)
    m1 = rnd(ks[4], (512,), 0.05)
    v1 = 1.0 + jnp.abs(rnd(ks[5], (512,), 0.05))
    w2 = rnd(ks[6], (256, 512), 0.02)
    b2 = rnd(ks[7], (256,), 0.02)
    g2 = 1.0 + rnd(ks[8], (256,), 0.05)
    be2 = rnd(ks[9], (256,), 0.05)
    m2 = rnd(ks[10], (256,), 0.05)
    v2 = 1.0 + jnp.abs(rnd(ks[11], (256,), 0.05))
    w3 = rnd(ks[12], (num_weight, 256), 0.02)
    b3 = rnd(ks[13], (num_weight,), 0.02)
    return (w1, b1, g1, be1, m1, v1,
            w2, b2, g2, be2, m2, v2,
            w3, b3)


if __name__ == "__main__":
    B = 40            # non-multiple of the tile -> exercises the ragged block
    NUM_WEIGHT = 16

    key = jax.random.PRNGKey(0)
    k_x, k_p = jax.random.split(key)
    x = jax.random.normal(k_x, (B, 1024), dtype=jnp.float32)
    params = make_params(k_p, NUM_WEIGHT)

    # One-time weight preparation (fold BN, transpose, bf16 cast, pad fc3).
    prepared = prepare_params(params, NUM_WEIGHT)

    y = weight_pred_net(x, prepared)
    y = jax.block_until_ready(y)

    # Sanity: shape, softmax rows sum to 1, matches f32 reference (bf16 tol).
    y_f32 = y.astype(jnp.float32)
    y_ref = weight_pred_ref(x, params)
    row_sums = jnp.sum(y_f32, axis=1)
    assert y.shape == (B, NUM_WEIGHT)
    assert bool(jnp.all(jnp.abs(row_sums - 1.0) < 1e-2))
    assert bool(jnp.all(jnp.abs(y_f32 - y_ref) < 3e-2))

    print("KERNEL_OK")
</pallas_src>

<mosaic_0001>
module attributes {stable_mosaic.version = 11 : i64} {
  func.func @weight_pred_kernel(%arg0: i32, %arg1: memref<32x1024xbf16, #tpu.memory_space<vmem>>, %arg2: memref<1024x512xbf16, #tpu.memory_space<vmem>>, %arg3: memref<1x512xf32, #tpu.memory_space<vmem>>, %arg4: memref<512x256xbf16, #tpu.memory_space<vmem>>, %arg5: memref<1x256xf32, #tpu.memory_space<vmem>>, %arg6: memref<256x128xbf16, #tpu.memory_space<vmem>>, %arg7: memref<1x128xf32, #tpu.memory_space<vmem>>, %arg8: memref<32x128xbf16, #tpu.memory_space<vmem>>) attributes {dimension_semantics = [#tpu.dimension_semantics<parallel>], iteration_bounds = array<i64: 2>, scalar_prefetch = 0 : i64, scratch_operands = 0 : i64, tpu.core_type = #tpu.core_type<tc>, window_params = [{transform_indices = @transform_0, window_bounds = array<i64: 32, 1024>}, {pipeline_mode = #tpu.pipeline_mode<synchronous>, transform_indices = @transform_1, window_bounds = array<i64: 1024, 512>}, {pipeline_mode = #tpu.pipeline_mode<synchronous>, transform_indices = @transform_2, window_bounds = array<i64: 1, 512>}, {pipeline_mode = #tpu.pipeline_mode<synchronous>, transform_indices = @transform_3, window_bounds = array<i64: 512, 256>}, {pipeline_mode = #tpu.pipeline_mode<synchronous>, transform_indices = @transform_4, window_bounds = array<i64: 1, 256>}, {pipeline_mode = #tpu.pipeline_mode<synchronous>, transform_indices = @transform_5, window_bounds = array<i64: 256, 128>}, {pipeline_mode = #tpu.pipeline_mode<synchronous>, transform_indices = @transform_6, window_bounds = array<i64: 1, 128>}, {transform_indices = @transform_7, window_bounds = array<i64: 32, 128>}]} {
    %c0 = arith.constant 0 : index
    %c0_0 = arith.constant 0 : index
    %0 = vector.load %arg1[%c0, %c0_0] : memref<32x1024xbf16, #tpu.memory_space<vmem>>, vector<32x1024xbf16>
    %c0_1 = arith.constant 0 : index
    %c0_2 = arith.constant 0 : index
    %1 = vector.load %arg2[%c0_1, %c0_2] : memref<1024x512xbf16, #tpu.memory_space<vmem>>, vector<1024x512xbf16>
    %cst = arith.constant dense<0.000000e+00> : vector<32x512xf32>
    %2 = tpu.matmul %0, %1, %cst {dimension_numbers = #tpu.dot_dimension_numbers<[1], [0], [0], [1], [0, 0, 1, 1], [], []>} : vector<32x1024xbf16>, vector<1024x512xbf16>, vector<32x512xf32> -> vector<32x512xf32>
    %c0_3 = arith.constant 0 : index
    %c0_4 = arith.constant 0 : index
    %3 = vector.load %arg3[%c0_3, %c0_4] : memref<1x512xf32, #tpu.memory_space<vmem>>, vector<1x512xf32>
    %4 = vector.broadcast %3 : vector<1x512xf32> to vector<32x512xf32>
    %5 = arith.addf %2, %4 : vector<32x512xf32>
    %cst_5 = arith.constant 0.000000e+00 : f32
    %6 = vector.broadcast %cst_5 : f32 to vector<32x512xf32>
    %7 = arith.maximumf %5, %6 : vector<32x512xf32>
    %8 = arith.truncf %7 : vector<32x512xf32> to vector<32x512xbf16>
    %c0_6 = arith.constant 0 : index
    %c0_7 = arith.constant 0 : index
    %9 = vector.load %arg4[%c0_6, %c0_7] : memref<512x256xbf16, #tpu.memory_space<vmem>>, vector<512x256xbf16>
    %cst_8 = arith.constant dense<0.000000e+00> : vector<32x256xf32>
    %10 = tpu.matmul %8, %9, %cst_8 {dimension_numbers = #tpu.dot_dimension_numbers<[1], [0], [0], [1], [0, 0, 1, 1], [], []>} : vector<32x512xbf16>, vector<512x256xbf16>, vector<32x256xf32> -> vector<32x256xf32>
    %c0_9 = arith.constant 0 : index
    %c0_10 = arith.constant 0 : index
    %11 = vector.load %arg5[%c0_9, %c0_10] : memref<1x256xf32, #tpu.memory_space<vmem>>, vector<1x256xf32>
    %12 = vector.broadcast %11 : vector<1x256xf32> to vector<32x256xf32>
    %13 = arith.addf %10, %12 : vector<32x256xf32>
    %cst_11 = arith.constant 0.000000e+00 : f32
    %14 = vector.broadcast %cst_11 : f32 to vector<32x256xf32>
    %15 = arith.maximumf %13, %14 : vector<32x256xf32>
    %16 = arith.truncf %15 : vector<32x256xf32> to vector<32x256xbf16>
    %c0_12 = arith.constant 0 : index
    %c0_13 = arith.constant 0 : index
    %17 = vector.load %arg6[%c0_12, %c0_13] : memref<256x128xbf16, #tpu.memory_space<vmem>>, vector<256x128xbf16>
    %cst_14 = arith.constant dense<0.000000e+00> : vector<32x128xf32>
    %18 = tpu.matmul %16, %17, %cst_14 {dimension_numbers = #tpu.dot_dimension_numbers<[1], [0], [0], [1], [0, 0, 1, 1], [], []>} : vector<32x256xbf16>, vector<256x128xbf16>, vector<32x128xf32> -> vector<32x128xf32>
    %c0_15 = arith.constant 0 : index
    %c0_16 = arith.constant 0 : index
    %19 = vector.load %arg7[%c0_15, %c0_16] : memref<1x128xf32, #tpu.memory_space<vmem>>, vector<1x128xf32>
    %20 = vector.broadcast %19 : vector<1x128xf32> to vector<32x128xf32>
    %21 = arith.addf %18, %20 : vector<32x128xf32>
    %cst_17 = arith.constant dense<0xFF800000> : vector<32xf32>
    %22 = vector.multi_reduction <maximumf>, %21, %cst_17 [1] : vector<32x128xf32> to vector<32xf32>
    %23 = vector.shape_cast %22 : vector<32xf32> to vector<32x1xf32>
    %24 = vector.broadcast %23 : vector<32x1xf32> to vector<32x128xf32>
    %25 = arith.subf %21, %24 : vector<32x128xf32>
    %26 = math.exp %25 : vector<32x128xf32>
    %cst_18 = arith.constant dense<0.000000e+00> : vector<32xf32>
    %27 = vector.multi_reduction <add>, %26, %cst_18 [1] : vector<32x128xf32> to vector<32xf32>
    %28 = vector.shape_cast %27 : vector<32xf32> to vector<32x1xf32>
    %29 = tpu.reciprocal %28 {approx = true} : vector<32x1xf32> -> vector<32x1xf32>
    %30 = vector.broadcast %29 : vector<32x1xf32> to vector<32x128xf32>
    %31 = arith.mulf %26, %30 : vector<32x128xf32>
    %32 = arith.truncf %31 : vector<32x128xf32> to vector<32x128xbf16>
    %c0_19 = arith.constant 0 : index
    %c0_20 = arith.constant 0 : index
    %33 = vector.load %arg8[%c0_19, %c0_20] : memref<32x128xbf16, #tpu.memory_space<vmem>>, vector<32x128xbf16>
    tpu.vector_store %arg8[%c0_19, %c0_20], %32 {strides = array<i32>} : memref<32x128xbf16, #tpu.memory_space<vmem>>, vector<32x128xbf16>,
    return
  }
  func.func @transform_0(%arg0: i32) -> (i32, i32) {
    %c0_i32 = arith.constant 0 : i32
    %c0_i32_0 = arith.constant 0 : i32
    return %arg0, %c0_i32 : i32, i32
  }
  func.func @transform_1(%arg0: i32) -> (i32, i32) {
    %c0_i32 = arith.constant 0 : i32
    %c0_i32_0 = arith.constant 0 : i32
    %c0_i32_1 = arith.constant 0 : i32
    return %c0_i32, %c0_i32_0 : i32, i32
  }
  func.func @transform_2(%arg0: i32) -> (i32, i32) {
    %c0_i32 = arith.constant 0 : i32
    %c0_i32_0 = arith.constant 0 : i32
    %c0_i32_1 = arith.constant 0 : i32
    return %c0_i32, %c0_i32_0 : i32, i32
  }
  func.func @transform_3(%arg0: i32) -> (i32, i32) {
    %c0_i32 = arith.constant 0 : i32
    %c0_i32_0 = arith.constant 0 : i32
    %c0_i32_1 = arith.constant 0 : i32
    return %c0_i32, %c0_i32_0 : i32, i32
  }
  func.func @transform_4(%arg0: i32) -> (i32, i32) {
    %c0_i32 = arith.constant 0 : i32
    %c0_i32_0 = arith.constant 0 : i32
    %c0_i32_1 = arith.constant 0 : i32
    return %c0_i32, %c0_i32_0 : i32, i32
  }
  func.func @transform_5(%arg0: i32) -> (i32, i32) {
    %c0_i32 = arith.constant 0 : i32
    %c0_i32_0 = arith.constant 0 : i32
    %c0_i32_1 = arith.constant 0 : i32
    return %c0_i32, %c0_i32_0 : i32, i32
  }
  func.func @transform_6(%arg0: i32) -> (i32, i32) {
    %c0_i32 = arith.constant 0 : i32
    %c0_i32_0 = arith.constant 0 : i32
    %c0_i32_1 = arith.constant 0 : i32
    return %c0_i32, %c0_i32_0 : i32, i32
  }
  func.func @transform_7(%arg0: i32) -> (i32, i32) {
    %c0_i32 = arith.constant 0 : i32
    %c0_i32_0 = arith.constant 0 : i32
    return %arg0, %c0_i32 : i32, i32
  }
}

</mosaic_0001>

<bundles_post_ra>
// kernel: tpu_custom_call.1
= control target key start
LH: loop header
LB: loop body
LE: loop exit
PB: predicated region body
PF: predicated region fallthrough
CT: control target
= control target key end

     0   :  { %s5079_s0 = inlined_call_operand.hbm [shape: bf16[40,1024], index: 0, kind: input, shape index: {}]   ;;  %s5080_s1 = inlined_call_operand.hbm [shape: bf16[1024,512], index: 1, kind: input, shape index: {}]   ;;  %s5081_s2 = inlined_call_operand.hbm [shape: f32[1,512], index: 2, kind: input, shape index: {}]   ;;  %s5082_s3 = inlined_call_operand.hbm [shape: bf16[512,256], index: 3, kind: input, shape index: {}]   ;;  %s5083_s4 = inlined_call_operand.vmem [shape: f32[1,256], index: 4, kind: input, shape index: {}]   ;;  %s5084_s5 = inlined_call_operand.hbm [shape: bf16[256,128], index: 5, kind: input, shape index: {}]   ;;  %s5085_s6 = inlined_call_operand.vmem [shape: f32[1,128], index: 6, kind: input, shape index: {}]   ;;  %s5086_s7 = inlined_call_operand.hbm [shape: bf16[40,128], index: 7, kind: output, shape index: {}]  }
   0x1   :  { %5090 = sst [smem:[#allocation17_spill]] %s5080_s1 }
   0x2   :  { %12 = vsyncpa [#allocation3], 0 }
   0x3   :  { %14 = vsyncpa [#allocation3 + $0x1], 0 }
   0x4   :  { %15 = vsyncpa [#allocation6], 0 }
   0x5   :  { %16 = vsyncpa [#allocation9], 0 }
   0x6   :  { %17 = vsyncpa [#allocation4], 0 }
   0x7   :  { %19 = vsyncpa [#allocation4 + $0x1], 0  ;;  %s4674_s24 = smov 0   ;;  %s4676_s25 = smov 0  }
   0x8   :  { %s4678_s26 = smov 0   ;;  %s4680_s27 = smov 0  }
   0x9 LB: > { %s4695_s28 = sadd.s32 4294967295, %s4616_s27   ;;  %s3360_s29 = sadd.s32 4294967294, %s4616_s27   ;;  %s4616_s27 = sphi %s4680_s27, %s5111_s27   ;;  %s4612_s26 = sphi %s4678_s26, %s5110_s26   ;;  %s4608_s25 = sphi %s4676_s25, %s5109_s25   ;;  %s4604_s24 = sphi %s4674_s24, %s5108_s24  }
   0xa   : > { %s4699_s30 = sadd.s32 1, %s4616_s27   ;;  %s32_s8 = sadd.s32 1, %s4612_s26 }
   0xb   : > { %s29_s9 = ssub.s32 %s4616_s27, %s4699_s30  ;;  %p39_p0 = scmp.ne.s32.totalorder %s4612_s26, %s4608_s25 }
   0xc   : > { %p30_p1 = scmp.eq.s32.totalorder %s29_s9, 0  ;;  %p40_p2 = scmp.eq.s32.totalorder %s4616_s27, 0 }
   0xd   : > { %p45_p3 = scmp.ne.s32.totalorder %s4608_s25, %s4604_s24  ;;  %p5087_p4 = scmp.eq.s32.totalorder %s4695_s28, 0 }
   0xe   : > { %s4711_s10 = scalar_select %p30_p1, %s4612_s26, %s32_s8  }
   0xf   : > { %p4713_p5 = por %p40_p2, %p39_p0  ;;  %p4719_p6 = por %p5087_p4, %p45_p3 }
  0x10   : > { %5091 = sst [smem:[#allocation16_spill]] %s4711_s10  ;;  %p195_p7 = scmp.eq.s32.totalorder %s4695_s28, 1 }
  0x11   : > { %s5093_s12 = scalar_select %p4719_p6, 1, 0 }
  0x12   : > { %p201_p8 = scmp.eq.s32.totalorder %s3360_s29, 1  ;;  %p3361_p9 = scmp.ge.s32.totalorder %s4616_s27, 1 }
  0x13   : > { %p208_p10 = scmp.lt.s32.totalorder %s4616_s27, 3  ;;  %p4726_p11 = por %p195_p7, %p39_p0 }
  0x14   : > { %p4730_p12 = por %p201_p8, %p45_p3  ;;  %s4618_s16 = smov [#allocation5]  }
  0x15   : > { %s5094_s13 = scalar_select %p4726_p11, 1, 0 }
  0x16   : > { %s5095_s14 = scalar_select %p4730_p12, 1, 0 }
  0x17   : > { %p4734_p13 = pnand %p3361_p9, %p208_p10  ;;  %s220_s17 = sshll.u32 %s4618_s16, 4  ;;  %s221_s17 = int_to_ptr.vmem [resolvable:$true] %s220_s17 }
  0x18   : > { %s4619_s19 = smov [#allocation8]   ;;  %s4425_s21 = scalar_lea.vmem %s221_s17, 32768 }
  0x19   : > { %s5096_s15 = scalar_select %p4734_p13, 1, 0 }
  0x1a   : > { %p3830_p1 = pneg %p4734_p13  ;;  %s244_s20 = sshll.u32 %s4619_s19, 4  ;;  %s245_s20 = int_to_ptr.vmem [resolvable:$true] %s244_s20 }
  0x1b   : > { %p4426_p3 = scmp.ne.s32.totalorder %s221_s17, %s4425_s21  ;;  %p4433_p9 = scmp.lt.s32.totalorder %s221_s17, %s221_s17 }
  0x1c   : > { %p4742_p2 = pnand %p3830_p1, %p5087_p4  ;;  %p4434_p10 = scmp.lt.s32.totalorder %s4425_s21, %s4425_s21 }
  0x1e   : > { %p4416_p0 = pneg %p4742_p2  ;;  %p4435_p12 = por %p4434_p10, %p4433_p9 }
  0x20   : > { %p4428_p7 = pnand %p4426_p3, %p4416_p0 }
  0x22   : > { %p4429_p8 = pneg %p4428_p7 }
  0x24   : > { %p4436_p1 = pnand %p4435_p12, %p4429_p8 }
  0x26   : > { %4439 = shalt.err (!%p4436_p1)
}
  0x27   : > { %s4620_s22 = smov 256   ;;  %s4621_s23 = smov 16  }
  0x28   : > { %s5098_s1 = sld [smem:[#allocation17_spill]]  ;;  %s4451_s9 = scalar_lea.vmem %s245_s20, 8192 }
  0x29   : > { %p4452_p4 = scmp.ne.s32.totalorder %s245_s20, %s4451_s9  ;;  %p4459_p11 = scmp.lt.s32.totalorder %s245_s20, %s245_s20 }
  0x2a   : > { %p4460_p6 = scmp.lt.s32.totalorder %s4451_s9, %s4451_s9 }
  0x2b   : > { %p4454_p3 = pnand %p4452_p4, %p4416_p0 }
  0x2c   : > { %p4461_p9 = por %p4460_p6, %p4459_p11 }
  0x2d   : > { %p4455_p7 = pneg %p4454_p3 }
  0x2e   : > { %3833 = dma.hbm_to_vmem [thread:$0]  (!%p4742_p2), %s5098_s1, 32768, %s221_s17, [#allocation6], %s4620_s22, %s4620_s22, %s4621_s23  }
  0x2f   : > { %p4462_p12 = pnand %p4461_p9, %p4455_p7 }
  0x31   : > { %4465 = shalt.err (!%p4462_p12)
}
  0x32   : > { %s4622_s16 = smov 128   ;;  %s4623_s19 = smov 8  }
  0x33   : > { %3839 = dma.hbm_to_vmem [thread:$0]  (!%p4742_p2), %s5082_s3, 8192, %s245_s20, [#allocation9], %s4622_s16, %s4622_s16, %s4623_s19  }
  0x34   : > { %s4624_s17 = smov [#allocation7]   ;;  %s4625_s23 = smov [#allocation10]  }
  0x35   : > { %s234_s22 = sshll.u32 %s4624_s17, 4  ;;  %s260_s29 = sshll.u32 %s4625_s23, 4  ;;  %s235_s22 = int_to_ptr.vmem [resolvable:$true] %s234_s22  ;;  %s261_s29 = int_to_ptr.vmem [resolvable:$true] %s260_s29 }
  0x36   : > { %s4477_s8 = scalar_lea.vmem %s235_s22, 64  ;;  %p4485_p8 = scmp.lt.s32.totalorder %s235_s22, %s235_s22 }
  0x37   : > { %p4478_p4 = scmp.ne.s32.totalorder %s235_s22, %s4477_s8  ;;  %p4486_p10 = scmp.lt.s32.totalorder %s4477_s8, %s4477_s8 }
  0x39   : > { %p4480_p6 = pnand %p4478_p4, %p4416_p0  ;;  %p4487_p1 = por %p4486_p10, %p4485_p8 }
  0x3b   : > { %p4481_p11 = pneg %p4480_p6 }
  0x3d   : > { %p4488_p3 = pnand %p4487_p1, %p4481_p11 }
  0x3f   : > { %4491 = shalt.err (!%p4488_p3)
}
  0x40   : > { %3836 = dma.hbm_to_vmem [thread:$0]  (!%p4742_p2), %s5081_s2, 64, %s235_s22, [#allocation6]  }
  0x41   : > { %s4503_s9 = scalar_lea.vmem %s261_s29, 2048  ;;  %p4511_p4 = scmp.lt.s32.totalorder %s261_s29, %s261_s29 }
  0x42   : > { %p4504_p7 = scmp.ne.s32.totalorder %s261_s29, %s4503_s9  ;;  %p4512_p6 = scmp.lt.s32.totalorder %s4503_s9, %s4503_s9 }
  0x44   : > { %p4506_p9 = pnand %p4504_p7, %p4416_p0  ;;  %p4513_p13 = por %p4512_p6, %p4511_p4 }
  0x46   : > { %p4507_p12 = pneg %p4506_p9 }
  0x48   : > { %p4514_p8 = pnand %p4513_p13, %p4507_p12 }
  0x4a   : > { %4517 = shalt.err (!%p4514_p8)
}
  0x4b   : > { %s4626_s16 = smov 64   ;;  %s4627_s19 = smov 4  }
  0x4c   : > { %3842 = dma.hbm_to_vmem [thread:$0]  (!%p4742_p2), %s5084_s5, 2048, %s261_s29, [#allocation9], %s4626_s16, %s4626_s16, %s4627_s19  }
  0x4d   : > { %p3366_p11 = scmp.ge.s32.totalorder %s4616_s27, 2 }
  0x4f   : > { %273 = sbr.rel (%p3366_p11) target bundleno = 116 (0x74), region = 40 }
  0x54   : > { %276 = sbr.rel (!%p4713_p5) target bundleno = 116 (0x74), region = 44  ;;  %s277_s22 = sand.u32 (%p4713_p5), 1, %s4612_s26  }
  0x55   : > { %s3368_s23 = sshll.u32 (%p4713_p5), %s4616_s27, 2  ;;  %s3367_s8 = sshll.u32 (%p4713_p5), %s277_s22, 7 }
  0x56   : > { %s283_s10 = ssub.s32 (%p4713_p5), 5, %s3368_s23  ;;  %s4790_s20 = scalar_lea.sflag (%p4713_p5), [#allocation3], %s277_s22 }
  0x57   : > { %p284_p13 = scmp.lt.s32.totalorder (%p4713_p5), %s283_s10, 4  ;;  %s281_s9 = scalar_lea.vmem (%p4713_p5), [#allocation2], %s3367_s8 }
  0x59   : > { %s5113_s10 = smov (!%p284_p13, %s283_s10), 4 }
  0x5a   : > { %s4787_s18 = sshll.u32 %s5113_s10, 9 }
  0x5b   : > { %s289_s29 = ssub.s32 2048, %s4787_s18 }
  0x5c   : > { %290 = vsyncadd %s4790_s20, %s289_s29  ;;  %p3371_p5 = scmp.ne.s32.totalorder %s4787_s18, 0  ;;  %s3751_s11 = sshll.u32 %s4616_s27, 11 }
  0x5d   : > { %s4798_s21 = scalar_lea.hbm %s5079_s0, %s3751_s11  ;;  %s296_s17 = sshll.u32 %s281_s9, 4  ;;  %s4800_s17 = int_to_ptr.vmem [resolvable:$true] %s296_s17 }
  0x5e   : > { %s4518_s22 = scalar_lea.hbm %s4798_s21, %s4787_s18  ;;  %s4522_s10 = scalar_lea.hbm %s5079_s0, 2560 }
  0x5f   : > { %p4519_p2 = scmp.ne.s32.totalorder %s4798_s21, %s4518_s22  ;;  %p4523_p1 = scmp.lt.s32.totalorder %s4798_s21, %s5079_s0 }
  0x60   : > { %p4524_p3 = scmp.lt.s32.totalorder %s4522_s10, %s4518_s22 }
  0x61   : > { %p4520_p0 = pnand %p4519_p2, %p3371_p5 }
  0x62   : > { %p4525_p7 = por %p4524_p3, %p4523_p1 }
  0x63   : > { %p4521_p10 = pneg %p4520_p0 }
  0x65   : > { %p4526_p9 = pnand %p4525_p7, %p4521_p10 }
  0x67   : > { %4529 = shalt.err (!%p4526_p9)
}
  0x68   : > { %s4530_s9 = scalar_lea.vmem %s4800_s17, %s4787_s18  ;;  %s4628_s11 = smov [#allocation2]  }
  0x69   : > { %p4531_p12 = scmp.ne.s32.totalorder %s4800_s17, %s4530_s9  ;;  %s4534_s16 = sshll.u32 %s4628_s11, 4  ;;  %s4535_s16 = int_to_ptr.vmem [resolvable:$false] %s4534_s16 }
  0x6a   : > { %s4536_s19 = scalar_lea.vmem %s4535_s16, 4096  ;;  %p4537_p8 = scmp.lt.s32.totalorder %s4800_s17, %s4535_s16 }
  0x6b   : > { %p4532_p4 = pnand %p4531_p12, %p3371_p5  ;;  %p4538_p13 = scmp.lt.s32.totalorder %s4536_s19, %s4530_s9 }
  0x6d   : > { %p4533_p6 = pneg %p4532_p4  ;;  %p4539_p2 = por %p4538_p13, %p4537_p8 }
  0x6f   : > { %p4540_p0 = pnand %p4539_p2, %p4533_p6 }
  0x71   : > { %4543 = shalt.err (!%p4540_p0)
}
  0x72   : > { %s4629_s1 = smov 512   ;;  %s4630_s22 = smov 32  }
  0x73   : > { %302 = dma.hbm_to_vmem [thread:$0]  (%p3371_p5), %s4798_s21, %s4787_s18, %s4800_s17, %s4790_s20, %s4629_s1, %s4629_s1, %s4630_s22  }
  0x74 PF: > { %p5099_p10 = scmp.ne.s32.totalorder %s5096_s15, 0 }
  0x75   : > { %s4829_s23 = sand.u32 (!%p5099_p10), 1, %s4608_s25   ;;  %p5100_p1 = scmp.ne.s32.totalorder (!%p5099_p10), %s5093_s12, 0 }
  0x76   : > { %308 = sbr.rel (%p5099_p10) target bundleno = 1353 (0x549), region = 48  ;;  %s3377_s8 = sshll.u32 (!%p5099_p10), %s4829_s23, 7 }
  0x77   : > { %s311_s10 = scalar_lea.sflag (!%p5099_p10), [#allocation3], %s4829_s23  ;;  %s4833_s29 = scalar_lea.vmem (!%p5099_p10), [#allocation2], %s3377_s8 }
  0x7b   : > { %4587 = dma.done.wait (%p5100_p1), %s311_s10, 2048  }
  0x7c   : > { %4589 = vsyncadd (%p5100_p1), %s311_s10, 4294965248  ;;  %p5101_p5 = scmp.eq.s32.totalorder %s4695_s28, 0 }
  0x7e   : > { %4591 = dma.done.wait (%p5101_p5), [#allocation6], 32832   ;;  %p5102_p3 = pmov %p5101_p5 }
  0x80   : > { %4593 = vsyncadd (%p5102_p3), [#allocation6], 4294934464  ;;  %p5103_p7 = pmov %p5102_p3 }
  0x81   : > { %p5104_p9 = pmov %p5102_p3 }
  0x82   : > { %4595 = dma.done.wait (%p5103_p7), [#allocation9], 10240  }
  0x83   : > { %4597 = vsyncadd (%p5104_p9), [#allocation9], 4294957056  ;;  %v3902_v0 = vld [vmem:[#allocation5 + $0xe4] ss:$16 sps:$4 sm:$0xff]   ;;  %v3906_v2 = vld [vmem:[#allocation5 + $0xe0] ss:$16 sps:$4 sm:$0xff]  }
  0x84   : > { %v3904_v1 = vld [vmem:[#allocation5 + $0x2e4] ss:$16 sps:$4 sm:$0xff]   ;;  %2027 = vmatprep.subr.bf16.mxu0 %v3902_v0  ;;  %v3907_v3 = vld [vmem:[#allocation5 + $0x2e0] ss:$16 sps:$4 sm:$0xff]   ;;  %v374_v50 = vld [vmem:[%s4833_s29 + $0x8] sm:$0xff]  ;;  %s3382_s21 = sshll.u32 %s4829_s23, 4 }
  0x85   : > { %2080 = vmatprep.subr.bf16.mxu1 %v3904_v1  ;;  %v3908_v4 = vld [vmem:[#allocation5 + $0xc4] ss:$16 sps:$4 sm:$0xff]   ;;  %2028 = vmatpush1.bf16.msra.mxu0 %v3906_v2  ;;  %v3912_v6 = vld [vmem:[#allocation5 + $0xc0] ss:$16 sps:$4 sm:$0xff]   ;;  %v378_v51 = vld [vmem:[%s4833_s29 + $0x28] sm:$0xff]  ;;  %s360_s17 = scalar_lea.vmem [#allocation11], %s3382_s21 }
  0x86   : > { %2081 = vmatpush1.bf16.msra.mxu1 %v3907_v3  ;;  %v3910_v5 = vld [vmem:[#allocation5 + $0x2c4] ss:$16 sps:$4 sm:$0xff]   ;;  %2029 = vmatprep.subr.bf16.mxu0 %v3908_v4  ;;  %v3913_v7 = vld [vmem:[#allocation5 + $0x2c0] ss:$16 sps:$4 sm:$0xff]   ;;  %v4853_v55 = vcombine.high %v374_v50, %v378_v51  ;;  %s3230_s9 = scalar_lea.sflag [#allocation4], %s4829_s23  ;;  %p5105_p12 = scmp.ne.s32.totalorder %s5094_s13, 0 }
  0x87   : > { %2082 = vmatprep.subr.bf16.mxu1 %v3910_v5  ;;  %v3914_v8 = vld [vmem:[#allocation5 + $0xa4] ss:$16 sps:$4 sm:$0xff]   ;;  %v3918_v10 = vld [vmem:[#allocation5 + $0xa0] ss:$16 sps:$4 sm:$0xff]   ;;  %s3741_s11 = sshll.u32 (%p5105_p12), %s4695_s28, 2 }
  0x88   : > { %v3916_v9 = vld [vmem:[#allocation5 + $0x2a4] ss:$16 sps:$4 sm:$0xff]   ;;  %v3919_v11 = vld [vmem:[#allocation5 + $0x2a0] ss:$16 sps:$4 sm:$0xff]   ;;  %2112 = vmatprep.mubr.bf16.mxu1 %v4853_v55  ;;  %s3238_s16 = ssub.s32 (%p5105_p12), 5, %s3741_s11 }
  0x89   : > { %2030 = vmatpush1.bf16.msra.mxu0 %v3912_v6  ;;  %v3920_v12 = vld [vmem:[#allocation5 + $0x84] ss:$16 sps:$4 sm:$0xff]   ;;  %v3924_v14 = vld [vmem:[#allocation5 + $0x80] ss:$16 sps:$4 sm:$0xff]   ;;  %p3239_p4 = scmp.lt.s32.totalorder (%p5105_p12), %s3238_s16, 4 }
  0x8a   : > { %2083 = vmatpush1.bf16.msra.mxu1 %v3913_v7  ;;  %2031 = vmatprep.subr.bf16.mxu0 %v3914_v8  ;;  %v3922_v13 = vld [vmem:[#allocation5 + $0x284] ss:$16 sps:$4 sm:$0xff]   ;;  %v3925_v15 = vld [vmem:[#allocation5 + $0x280] ss:$16 sps:$4 sm:$0xff]  }
  0x8b   : > { %2084 = vmatprep.subr.bf16.mxu1 %v3916_v9  ;;  %v3926_v16 = vld [vmem:[#allocation5 + $0x64] ss:$16 sps:$4 sm:$0xff]   ;;  %v3930_v18 = vld [vmem:[#allocation5 + $0x60] ss:$16 sps:$4 sm:$0xff]   ;;  %v4859_v9 = vcombine.low %v374_v50, %v378_v51  ;;  %v4893_v50 = vld [vmem:[%s4833_s29 + $0x38] sm:$0xff] }
  0x8c   : > { %v3928_v17 = vld [vmem:[#allocation5 + $0x264] ss:$16 sps:$4 sm:$0xff]   ;;  %v3931_v19 = vld [vmem:[#allocation5 + $0x260] ss:$16 sps:$4 sm:$0xff]  }
  0x8d   : > { %2032 = vmatpush1.bf16.msra.mxu0 %v3918_v10  ;;  %v3932_v20 = vld [vmem:[#allocation5 + $0x44] ss:$16 sps:$4 sm:$0xff]   ;;  %v3936_v22 = vld [vmem:[#allocation5 + $0x40] ss:$16 sps:$4 sm:$0xff]  }
  0x8e   : > { %2085 = vmatpush1.bf16.msra.mxu1 %v3919_v11  ;;  %2033 = vmatprep.subr.bf16.mxu0 %v3920_v12  ;;  %v3934_v21 = vld [vmem:[#allocation5 + $0x244] ss:$16 sps:$4 sm:$0xff]   ;;  %v3937_v23 = vld [vmem:[#allocation5 + $0x240] ss:$16 sps:$4 sm:$0xff]  }
  0x8f   : > { %2086 = vmatprep.subr.bf16.mxu1 %v3922_v13  ;;  %v3938_v24 = vld [vmem:[#allocation5 + $0x24] ss:$16 sps:$4 sm:$0xff]   ;;  %v3942_v26 = vld [vmem:[#allocation5 + $0x20] ss:$16 sps:$4 sm:$0xff]  }
  0x90   : > { %v3940_v25 = vld [vmem:[#allocation5 + $0x224] ss:$16 sps:$4 sm:$0xff]   ;;  %v3943_v27 = vld [vmem:[#allocation5 + $0x220] ss:$16 sps:$4 sm:$0xff]  }
  0x91   : > { %2034 = vmatpush1.bf16.msra.mxu0 %v3924_v14  ;;  %v3944_v28 = vld [vmem:[#allocation5 + $0x4] ss:$16 sps:$4 sm:$0xff]   ;;  %v3948_v30 = vld [vmem:[#allocation5] ss:$16 sps:$4 sm:$0xff]  }
  0x92   : > { %2087 = vmatpush1.bf16.msra.mxu1 %v3925_v15  ;;  %2035 = vmatprep.subr.bf16.mxu0 %v3926_v16  ;;  %v3946_v29 = vld [vmem:[#allocation5 + $0x204] ss:$16 sps:$4 sm:$0xff]   ;;  %v3949_v31 = vld [vmem:[#allocation5 + $0x200] ss:$16 sps:$4 sm:$0xff]  }
  0x93   : > { %2088 = vmatprep.subr.bf16.mxu1 %v3928_v17  ;;  %v3950_v32 = vld [vmem:[#allocation5 + $0x1e4] ss:$16 sps:$4 sm:$0xff]   ;;  %v3954_v34 = vld [vmem:[#allocation5 + $0x1e0] ss:$16 sps:$4 sm:$0xff]  }
  0x94   : > { %v3952_v33 = vld [vmem:[#allocation5 + $0x3e4] ss:$16 sps:$4 sm:$0xff]   ;;  %v3955_v35 = vld [vmem:[#allocation5 + $0x3e0] ss:$16 sps:$4 sm:$0xff]  }
  0x95   : > { %2036 = vmatpush1.bf16.msra.mxu0 %v3930_v18  ;;  %v3956_v36 = vld [vmem:[#allocation5 + $0x1c4] ss:$16 sps:$4 sm:$0xff]   ;;  %v3960_v38 = vld [vmem:[#allocation5 + $0x1c0] ss:$16 sps:$4 sm:$0xff]  }
  0x96   : > { %2089 = vmatpush1.bf16.msra.mxu1 %v3931_v19  ;;  %2037 = vmatprep.subr.bf16.mxu0 %v3932_v20  ;;  %v3958_v37 = vld [vmem:[#allocation5 + $0x3c4] ss:$16 sps:$4 sm:$0xff]   ;;  %v3961_v39 = vld [vmem:[#allocation5 + $0x3c0] ss:$16 sps:$4 sm:$0xff]  }
  0x97   : > { %2090 = vmatprep.subr.bf16.mxu1 %v3934_v21  ;;  %v3962_v40 = vld [vmem:[#allocation5 + $0x1a4] ss:$16 sps:$4 sm:$0xff]   ;;  %v3966_v42 = vld [vmem:[#allocation5 + $0x1a0] ss:$16 sps:$4 sm:$0xff]  }
  0x98   : > { %v3964_v41 = vld [vmem:[#allocation5 + $0x3a4] ss:$16 sps:$4 sm:$0xff]   ;;  %v3967_v43 = vld [vmem:[#allocation5 + $0x3a0] ss:$16 sps:$4 sm:$0xff]  }
  0x99   : > { %2038 = vmatpush1.bf16.msra.mxu0 %v3936_v22  ;;  %v3968_v44 = vld [vmem:[#allocation5 + $0x184] ss:$16 sps:$4 sm:$0xff]   ;;  %v3972_v46 = vld [vmem:[#allocation5 + $0x180] ss:$16 sps:$4 sm:$0xff]  }
  0x9a   : > { %2091 = vmatpush1.bf16.msra.mxu1 %v3937_v23  ;;  %2039 = vmatprep.subr.bf16.mxu0 %v3938_v24  ;;  %v3970_v45 = vld [vmem:[#allocation5 + $0x384] ss:$16 sps:$4 sm:$0xff]   ;;  %v3973_v47 = vld [vmem:[#allocation5 + $0x380] ss:$16 sps:$4 sm:$0xff]  }
  0x9b   : > { %2092 = vmatprep.subr.bf16.mxu1 %v3940_v25  ;;  %v373_v48 = vld [vmem:[%s4833_s29] sm:$0xff] }
  0x9c   : > { %v377_v49 = vld [vmem:[%s4833_s29 + $0x20] sm:$0xff] }
  0x9d   : > { %2040 = vmatpush1.bf16.msra.mxu0 %v3942_v26  ;;  %v3974_v52 = vld [vmem:[#allocation5 + $0x164] ss:$16 sps:$4 sm:$0xff]   ;;  %v4851_v53 = vcombine.high %v373_v48, %v377_v49  ;;  %v3978_v56 = vld [vmem:[#allocation5 + $0x160] ss:$16 sps:$4 sm:$0xff]   ;;  %v4857_v8 = vcombine.low %v373_v48, %v377_v49  ;;  %v4886_v48 = vld [vmem:[%s4833_s29 + $0x18] sm:$0xff] }
  0x9e   : > { %2093 = vmatpush1.bf16.msra.mxu1 %v3943_v27  ;;  %2041 = vmatprep.subr.bf16.mxu0 %v3944_v28  ;;  %v3976_v54 = vld [vmem:[#allocation5 + $0x364] ss:$16 sps:$4 sm:$0xff]   ;;  %v3979_v57 = vld [vmem:[#allocation5 + $0x360] ss:$16 sps:$4 sm:$0xff]   ;;  %v4897_v51 = vcombine.high %v4886_v48, %v4893_v50 }
  0x9f   : > { %2094 = vmatprep.subr.bf16.mxu1 %v3946_v29  ;;  %2059 = vmatprep.mubr.bf16.mxu0 %v4851_v53  ;;  %v3980_v58 = vld [vmem:[#allocation5 + $0x144] ss:$16 sps:$4 sm:$0xff]   ;;  %v3984_v60 = vld [vmem:[#allocation5 + $0x140] ss:$16 sps:$4 sm:$0xff]  }
  0xa0   : > { %v3982_v59 = vld [vmem:[#allocation5 + $0x344] ss:$16 sps:$4 sm:$0xff]   ;;  %v3985_v61 = vld [vmem:[#allocation5 + $0x340] ss:$16 sps:$4 sm:$0xff]  }
  0xa1   : > { %2042 = vmatpush1.bf16.msra.mxu0 %v3948_v30  ;;  %v3986_v62 = vld [vmem:[#allocation5 + $0x124] ss:$16 sps:$4 sm:$0xff]   ;;  %v3990_v0 = vld [vmem:[#allocation5 + $0x120] ss:$16 sps:$4 sm:$0xff]   ;;  %v382_v30 = vld [vmem:[%s4833_s29 + $0x48] sm:$0xff] }
  0xa2   : > { %2095 = vmatpush1.bf16.msra.mxu1 %v3949_v31  ;;  %2043 = vmatprep.subr.bf16.mxu0 %v3950_v32  ;;  %v3988_v63 = vld [vmem:[#allocation5 + $0x324] ss:$16 sps:$4 sm:$0xff]   ;;  %v3991_v1 = vld [vmem:[#allocation5 + $0x320] ss:$16 sps:$4 sm:$0xff]   ;;  %v386_v31 = vld [vmem:[%s4833_s29 + $0x68] sm:$0xff] }
  0xa3   : > { %2096 = vmatprep.subr.bf16.mxu1 %v3952_v33  ;;  %v3992_v2 = vld [vmem:[#allocation5 + $0x104] ss:$16 sps:$4 sm:$0xff]   ;;  %v3996_v4 = vld [vmem:[#allocation5 + $0x100] ss:$16 sps:$4 sm:$0xff]  }
  0xa4   : > { %v3994_v3 = vld [vmem:[#allocation5 + $0x304] ss:$16 sps:$4 sm:$0xff]   ;;  %v3997_v5 = vld [vmem:[#allocation5 + $0x300] ss:$16 sps:$4 sm:$0xff]  }
  0xa5   : > { %2044 = vmatpush2.bf16.msra.mxu0 %v3954_v34  ;;  %v4000_v6 = vld [vmem:[#allocation5 + $0x4e4] ss:$16 sps:$4 sm:$0xff]   ;;  %v3998_v10 = vld [vmem:[#allocation5 + $0x4e0] ss:$16 sps:$4 sm:$0xff]  }
  0xa6   : > { %2097 = vmatpush2.bf16.msra.mxu1 %v3955_v35  ;;  %2045 = vmatprep.subr.bf16.mxu0 %v3956_v36  ;;  %v4003_v7 = vld [vmem:[#allocation5 + $0x6e4] ss:$16 sps:$4 sm:$0xff]   ;;  %v4001_v11 = vld [vmem:[#allocation5 + $0x6e0] ss:$16 sps:$4 sm:$0xff]   ;;  %v4871_v35 = vcombine.high %v382_v30, %v386_v31 }
  0xa7   : > { %2098 = vmatprep.subr.bf16.mxu1 %v3958_v37  ;;  %v4006_v12 = vld [vmem:[#allocation5 + $0x4c4] ss:$16 sps:$4 sm:$0xff]   ;;  %v4004_v14 = vld [vmem:[#allocation5 + $0x4c0] ss:$16 sps:$4 sm:$0xff]   ;;  %v4873_v37 = vcombine.low %v382_v30, %v386_v31 }
  0xa8   : > { %v4009_v13 = vld [vmem:[#allocation5 + $0x6c4] ss:$16 sps:$4 sm:$0xff]   ;;  %v4007_v15 = vld [vmem:[#allocation5 + $0x6c0] ss:$16 sps:$4 sm:$0xff]  }
  0xa9   : > { %2046 = vmatpush2.bf16.msra.mxu0 %v3960_v38  ;;  %v4012_v16 = vld [vmem:[#allocation5 + $0x4a4] ss:$16 sps:$4 sm:$0xff]   ;;  %v4010_v18 = vld [vmem:[#allocation5 + $0x4a0] ss:$16 sps:$4 sm:$0xff]  }
  0xaa   : > { %2099 = vmatpush2.bf16.msra.mxu1 %v3961_v39  ;;  %2047 = vmatprep.subr.bf16.mxu0 %v3962_v40  ;;  %v4015_v17 = vld [vmem:[#allocation5 + $0x6a4] ss:$16 sps:$4 sm:$0xff]   ;;  %v4013_v19 = vld [vmem:[#allocation5 + $0x6a0] ss:$16 sps:$4 sm:$0xff]  }
  0xab   : > { %2100 = vmatprep.subr.bf16.mxu1 %v3964_v41  ;;  %v4018_v20 = vld [vmem:[#allocation5 + $0x484] ss:$16 sps:$4 sm:$0xff]   ;;  %v4016_v22 = vld [vmem:[#allocation5 + $0x480] ss:$16 sps:$4 sm:$0xff]  }
  0xac   : > { %v4021_v21 = vld [vmem:[#allocation5 + $0x684] ss:$16 sps:$4 sm:$0xff]   ;;  %v4019_v23 = vld [vmem:[#allocation5 + $0x680] ss:$16 sps:$4 sm:$0xff]  }
  0xad   : > { %2048 = vmatpush2.bf16.msra.mxu0 %v3966_v42  ;;  %v4024_v24 = vld [vmem:[#allocation5 + $0x464] ss:$16 sps:$4 sm:$0xff]   ;;  %v4022_v26 = vld [vmem:[#allocation5 + $0x460] ss:$16 sps:$4 sm:$0xff]  }
  0xae   : > { %2101 = vmatpush2.bf16.msra.mxu1 %v3967_v43  ;;  %2049 = vmatprep.subr.bf16.mxu0 %v3968_v44  ;;  %v4027_v25 = vld [vmem:[#allocation5 + $0x664] ss:$16 sps:$4 sm:$0xff]   ;;  %v4025_v27 = vld [vmem:[#allocation5 + $0x660] ss:$16 sps:$4 sm:$0xff]  }
  0xaf   : > { %2102 = vmatprep.subr.bf16.mxu1 %v3970_v45  ;;  %v381_v28 = vld [vmem:[%s4833_s29 + $0x40] sm:$0xff]  ;;  %v383_v30 = vld [vmem:[%s4833_s29 + $0x50] sm:$0xff] }
  0xb0   : > { %v385_v29 = vld [vmem:[%s4833_s29 + $0x60] sm:$0xff]  ;;  %v387_v31 = vld [vmem:[%s4833_s29 + $0x70] sm:$0xff] }
  0xb1   : > { %2050 = vmatpush2.bf16.msra.mxu0 %v3972_v46  ;;  %v4030_v32 = vld [vmem:[#allocation5 + $0x444] ss:$16 sps:$4 sm:$0xff]   ;;  %v4867_v33 = vcombine.high %v381_v28, %v385_v29  ;;  %v4869_v34 = vcombine.low %v381_v28, %v385_v29  ;;  %v4028_v38 = vld [vmem:[#allocation5 + $0x440] ss:$16 sps:$4 sm:$0xff]   ;;  %v4094_v28 = vld [vmem:[#allocation5 + $0xe8] ss:$16 sps:$4 sm:$0xff]  }
  0xb2   : > { %2103 = vmatpush2.bf16.msra.mxu1 %v3973_v47  ;;  %2051 = vmatprep.subr.bf16.mxu0 %v3974_v52  ;;  %v4033_v36 = vld [vmem:[#allocation5 + $0x644] ss:$16 sps:$4 sm:$0xff]   ;;  %v4031_v39 = vld [vmem:[#allocation5 + $0x640] ss:$16 sps:$4 sm:$0xff]   ;;  %v4097_v29 = vld [vmem:[#allocation5 + $0x2e8] ss:$16 sps:$4 sm:$0xff]  }
  0xb3   : > { %2104 = vmatprep.subr.bf16.mxu1 %v3976_v54  ;;  %v4036_v40 = vld [vmem:[#allocation5 + $0x424] ss:$16 sps:$4 sm:$0xff]   ;;  %v4034_v42 = vld [vmem:[#allocation5 + $0x420] ss:$16 sps:$4 sm:$0xff]  }
  0xb4   : > { %v4039_v41 = vld [vmem:[#allocation5 + $0x624] ss:$16 sps:$4 sm:$0xff]   ;;  %v4037_v43 = vld [vmem:[#allocation5 + $0x620] ss:$16 sps:$4 sm:$0xff]  }
  0xb5   : > { %2052 = vmatpush2.bf16.msra.mxu0 %v3978_v56  ;;  %v4042_v44 = vld [vmem:[#allocation5 + $0x404] ss:$16 sps:$4 sm:$0xff]   ;;  %v4040_v52 = vld [vmem:[#allocation5 + $0x400] ss:$16 sps:$4 sm:$0xff]  }
  0xb6   : > { %2105 = vmatpush2.bf16.msra.mxu1 %v3979_v57  ;;  %2053 = vmatprep.subr.bf16.mxu0 %v3980_v58  ;;  %v4045_v45 = vld [vmem:[#allocation5 + $0x604] ss:$16 sps:$4 sm:$0xff]   ;;  %v4043_v54 = vld [vmem:[#allocation5 + $0x600] ss:$16 sps:$4 sm:$0xff]  }
  0xb7   : > { %2106 = vmatprep.subr.bf16.mxu1 %v3982_v59  ;;  %v4880_v46 = vld [vmem:[%s4833_s29 + $0x10] sm:$0xff] }
  0xb8   : > { %v4883_v47 = vld [vmem:[%s4833_s29 + $0x30] sm:$0xff] }
  0xb9   : > { %2054 = vmatpush2.bf16.msra.mxu0 %v3984_v60  ;;  %v4890_v49 = vcombine.high %v4880_v46, %v4883_v47  ;;  %v4048_v56 = vld [vmem:[#allocation5 + $0x5e4] ss:$16 sps:$4 sm:$0xff]   ;;  %v4046_v58 = vld [vmem:[#allocation5 + $0x5e0] ss:$16 sps:$4 sm:$0xff]  }
  0xba   : > { %2107 = vmatpush2.bf16.msra.mxu1 %v3985_v61  ;;  %2055 = vmatprep.subr.bf16.mxu0 %v3986_v62  ;;  %v4051_v57 = vld [vmem:[#allocation5 + $0x7e4] ss:$16 sps:$4 sm:$0xff]   ;;  %v4049_v59 = vld [vmem:[#allocation5 + $0x7e0] ss:$16 sps:$4 sm:$0xff]  }
  0xbb   : > { %2108 = vmatprep.subr.bf16.mxu1 %v3988_v63  ;;  %v4054_v60 = vld [vmem:[#allocation5 + $0x5c4] ss:$16 sps:$4 sm:$0xff]   ;;  %v4052_v62 = vld [vmem:[#allocation5 + $0x5c0] ss:$16 sps:$4 sm:$0xff]  }
  0xbc   : > { %v4057_v61 = vld [vmem:[#allocation5 + $0x7c4] ss:$16 sps:$4 sm:$0xff]   ;;  %v4055_v63 = vld [vmem:[#allocation5 + $0x7c0] ss:$16 sps:$4 sm:$0xff]  }
  0xbd   : > { %2056 = vmatpush2.bf16.msra.mxu0 %v3990_v0  ;;  %v4060_v0 = vld [vmem:[#allocation5 + $0x5a4] ss:$16 sps:$4 sm:$0xff]  }
  0xbe   : > { %2109 = vmatpush2.bf16.msra.mxu1 %v3991_v1  ;;  %2057 = vmatprep.subr.bf16.mxu0 %v3992_v2  ;;  %v4063_v1 = vld [vmem:[#allocation5 + $0x7a4] ss:$16 sps:$4 sm:$0xff]   ;;  %v4058_v2 = vld [vmem:[#allocation5 + $0x5a0] ss:$16 sps:$4 sm:$0xff]  }
  0xbf   : > { %2110 = vmatprep.subr.bf16.mxu1 %v3994_v3  ;;  %v4061_v3 = vld [vmem:[#allocation5 + $0x7a0] ss:$16 sps:$4 sm:$0xff]  }
  0xc1   : > { %2058 = vmatpush2.bf16.msra.mxu0 %v3996_v4  ;;  %v4066_v4 = vld [vmem:[#allocation5 + $0x584] ss:$16 sps:$4 sm:$0xff]  }
  0xc2   : > { %2111 = vmatpush2.bf16.msra.mxu1 %v3997_v5  ;;  %2133 = vmatprep.subr.bf16.mxu0 %v4000_v6  ;;  %v4069_v5 = vld [vmem:[#allocation5 + $0x784] ss:$16 sps:$4 sm:$0xff]   ;;  %v4064_v6 = vld [vmem:[#allocation5 + $0x580] ss:$16 sps:$4 sm:$0xff]  }
  0xc3   : > { %2186 = vmatprep.subr.bf16.mxu1 %v4003_v7  ;;  %v4067_v7 = vld [vmem:[#allocation5 + $0x780] ss:$16 sps:$4 sm:$0xff]  }
  0xc4   : > { %2060 = vmatmul.mubr.bf16.vlgmr.msra.gmra.mxu0 %v4857_v8 }
  0xc5   : > { %2113 = vmatmul.mubr.bf16.vlgmr.msra.gmra.mxu1 %v4859_v9  ;;  %2134 = vmatpush1.bf16.msra.mxu0 %v3998_v10  ;;  %v4072_v10 = vld [vmem:[#allocation5 + $0x564] ss:$16 sps:$4 sm:$0xff]  }
  0xc6   : > { %2187 = vmatpush1.bf16.msra.mxu1 %v4001_v11  ;;  %2135 = vmatprep.subr.bf16.mxu0 %v4006_v12  ;;  %v4075_v11 = vld [vmem:[#allocation5 + $0x764] ss:$16 sps:$4 sm:$0xff]   ;;  %v4070_v12 = vld [vmem:[#allocation5 + $0x560] ss:$16 sps:$4 sm:$0xff]  }
  0xc7   : > { %2188 = vmatprep.subr.bf16.mxu1 %v4009_v13  ;;  %2069 = vmatprep.mubr.bf16.mxu0 %v4867_v33  ;;  %v4073_v13 = vld [vmem:[#allocation5 + $0x760] ss:$16 sps:$4 sm:$0xff]  }
  0xc8   : > { %2122 = vmatprep.mubr.bf16.mxu1 %v4871_v35 }
  0xc9   : > { %2136 = vmatpush1.bf16.msra.mxu0 %v4004_v14  ;;  %v4078_v14 = vld [vmem:[#allocation5 + $0x544] ss:$16 sps:$4 sm:$0xff]  }
  0xca   : > { %2189 = vmatpush1.bf16.msra.mxu1 %v4007_v15  ;;  %2137 = vmatprep.subr.bf16.mxu0 %v4012_v16  ;;  %v4081_v15 = vld [vmem:[#allocation5 + $0x744] ss:$16 sps:$4 sm:$0xff]   ;;  %v4076_v16 = vld [vmem:[#allocation5 + $0x540] ss:$16 sps:$4 sm:$0xff]  }
  0xcb   : > { %2190 = vmatprep.subr.bf16.mxu1 %v4015_v17  ;;  %v4079_v17 = vld [vmem:[#allocation5 + $0x740] ss:$16 sps:$4 sm:$0xff]  }
  0xcc   : > { %2070 = vmatmul.mubr.bf16.gmra.mxu0 %v4869_v34 }
  0xcd   : > { %2138 = vmatpush1.bf16.msra.mxu0 %v4010_v18  ;;  %2123 = vmatmul.mubr.bf16.gmra.mxu1 %v4873_v37  ;;  %v4084_v18 = vld [vmem:[#allocation5 + $0x524] ss:$16 sps:$4 sm:$0xff]  }
  0xce   : > { %2191 = vmatpush1.bf16.msra.mxu1 %v4013_v19  ;;  %2139 = vmatprep.subr.bf16.mxu0 %v4018_v20  ;;  %v4087_v19 = vld [vmem:[#allocation5 + $0x724] ss:$16 sps:$4 sm:$0xff]   ;;  %v4082_v20 = vld [vmem:[#allocation5 + $0x520] ss:$16 sps:$4 sm:$0xff]  }
  0xcf   : > { %2192 = vmatprep.subr.bf16.mxu1 %v4021_v21  ;;  %2165 = vmatprep.mubr.bf16.mxu0 %v4890_v49  ;;  %v4085_v21 = vld [vmem:[#allocation5 + $0x720] ss:$16 sps:$4 sm:$0xff]  }
  0xd0   : > { %2218 = vmatprep.mubr.bf16.mxu1 %v4897_v51 }
  0xd1   : > { %2140 = vmatpush1.bf16.msra.mxu0 %v4016_v22  ;;  %v4090_v22 = vld [vmem:[#allocation5 + $0x504] ss:$16 sps:$4 sm:$0xff]  }
  0xd2   : > { %2193 = vmatpush1.bf16.msra.mxu1 %v4019_v23  ;;  %2141 = vmatprep.subr.bf16.mxu0 %v4024_v24  ;;  %v4093_v23 = vld [vmem:[#allocation5 + $0x704] ss:$16 sps:$4 sm:$0xff]   ;;  %v4088_v24 = vld [vmem:[#allocation5 + $0x500] ss:$16 sps:$4 sm:$0xff]  }
  0xd3   : > { %2194 = vmatprep.subr.bf16.mxu1 %v4027_v25  ;;  %v4091_v25 = vld [vmem:[#allocation5 + $0x700] ss:$16 sps:$4 sm:$0xff]  }
  0xd5   : > { %2142 = vmatpush1.bf16.msra.mxu0 %v4022_v26  ;;  %v4096_v26 = vld [vmem:[#allocation5 + $0xec] ss:$16 sps:$4 sm:$0xff]  }
  0xd6   : > { %2195 = vmatpush1.bf16.msra.mxu1 %v4025_v27  ;;  %2143 = vmatprep.subr.bf16.mxu0 %v4030_v32  ;;  %v4099_v27 = vld [vmem:[#allocation5 + $0x2ec] ss:$16 sps:$4 sm:$0xff]   ;;  %v4905_v32 = vcombine.low %v4880_v46, %v4883_v47 }
  0xd7   : > { %2196 = vmatprep.subr.bf16.mxu1 %v4033_v36  ;;  %v4909_v36 = vcombine.low %v4886_v48, %v4893_v50  ;;  %v4108_v46 = vld [vmem:[#allocation5 + $0xac] ss:$16 sps:$4 sm:$0xff]   ;;  %v4921_v48 = vcombine.low %v383_v30, %v387_v31  ;;  %v4106_v50 = vld [vmem:[#allocation5 + $0xa8] ss:$16 sps:$4 sm:$0xff]  }
  0xd8   : > { %v4111_v47 = vld [vmem:[#allocation5 + $0x2ac] ss:$16 sps:$4 sm:$0xff]  }
  0xd9   : > { %2144 = vmatpush1.bf16.msra.mxu0 %v4028_v38  ;;  %v384_v38 = vld [vmem:[%s4833_s29 + $0x58] sm:$0xff] }
  0xda   : > { %2197 = vmatpush1.bf16.msra.mxu1 %v4031_v39  ;;  %2145 = vmatprep.subr.bf16.mxu0 %v4036_v40  ;;  %v388_v39 = vld [vmem:[%s4833_s29 + $0x78] sm:$0xff] }
  0xdb   : > { %2198 = vmatprep.subr.bf16.mxu1 %v4039_v41  ;;  %v4102_v40 = vld [vmem:[#allocation5 + $0xcc] ss:$16 sps:$4 sm:$0xff]  }
  0xdc   : > { %v4105_v41 = vld [vmem:[#allocation5 + $0x2cc] ss:$16 sps:$4 sm:$0xff]  }
  0xdd   : > { %2146 = vmatpush1.bf16.msra.mxu0 %v4034_v42  ;;  %v4913_v42 = vcombine.high %v383_v30, %v387_v31  ;;  %v4166_v30 = vld [vmem:[#allocation5 + $0x168] ss:$16 sps:$4 sm:$0xff]  }
  0xde   : > { %2199 = vmatpush1.bf16.msra.mxu1 %v4037_v43  ;;  %2147 = vmatprep.subr.bf16.mxu0 %v4042_v44  ;;  %v4915_v43 = vcombine.high %v384_v38, %v388_v39  ;;  %v4100_v44 = vld [vmem:[#allocation5 + $0xc8] ss:$16 sps:$4 sm:$0xff]  }
  0xdf   : > { %2200 = vmatprep.subr.bf16.mxu1 %v4045_v45  ;;  %v4103_v45 = vld [vmem:[#allocation5 + $0x2c8] ss:$16 sps:$4 sm:$0xff]  }
  0xe0   : > { %v4169_v31 = vld [vmem:[#allocation5 + $0x368] ss:$16 sps:$4 sm:$0xff]  }
  0xe1   : > { %2148 = vmatpush1.bf16.msra.mxu0 %v4040_v52  ;;  %v4109_v52 = vld [vmem:[#allocation5 + $0x2a8] ss:$16 sps:$4 sm:$0xff]  }
  0xe2   : > { %2201 = vmatpush1.bf16.msra.mxu1 %v4043_v54  ;;  %2149 = vmatprep.subr.bf16.mxu0 %v4048_v56  ;;  %v4923_v54 = vcombine.low %v384_v38, %v388_v39  ;;  %v4114_v56 = vld [vmem:[#allocation5 + $0x8c] ss:$16 sps:$4 sm:$0xff]  }
  0xe3   : > { %2202 = vmatprep.subr.bf16.mxu1 %v4051_v57  ;;  %v4117_v57 = vld [vmem:[#allocation5 + $0x28c] ss:$16 sps:$4 sm:$0xff]  }
  0xe4   : > { %v4174_v38 = vld [vmem:[#allocation5 + $0x14c] ss:$16 sps:$4 sm:$0xff]  }
  0xe5   : > { %2150 = vmatpush2.bf16.msra.mxu0 %v4046_v58  ;;  %v4112_v58 = vld [vmem:[#allocation5 + $0x88] ss:$16 sps:$4 sm:$0xff]   ;;  %v4177_v39 = vld [vmem:[#allocation5 + $0x34c] ss:$16 sps:$4 sm:$0xff]  }
  0xe6   : > { %2203 = vmatpush2.bf16.msra.mxu1 %v4049_v59  ;;  %2151 = vmatprep.subr.bf16.mxu0 %v4054_v60  ;;  %v4115_v59 = vld [vmem:[#allocation5 + $0x288] ss:$16 sps:$4 sm:$0xff]   ;;  %v4120_v60 = vld [vmem:[#allocation5 + $0x6c] ss:$16 sps:$4 sm:$0xff]  }
  0xe7   : > { %2204 = vmatprep.subr.bf16.mxu1 %v4057_v61  ;;  %v4123_v61 = vld [vmem:[#allocation5 + $0x26c] ss:$16 sps:$4 sm:$0xff]  }
  0xe9   : > { %2152 = vmatpush2.bf16.msra.mxu0 %v4052_v62  ;;  %v4118_v62 = vld [vmem:[#allocation5 + $0x68] ss:$16 sps:$4 sm:$0xff]  }
  0xea   : > { %2205 = vmatpush2.bf16.msra.mxu1 %v4055_v63  ;;  %2153 = vmatprep.subr.bf16.mxu0 %v4060_v0  ;;  %v4121_v63 = vld [vmem:[#allocation5 + $0x268] ss:$16 sps:$4 sm:$0xff]   ;;  %v4126_v0 = vld [vmem:[#allocation5 + $0x4c] ss:$16 sps:$4 sm:$0xff]  }
  0xeb   : > { %2206 = vmatprep.subr.bf16.mxu1 %v4063_v1  ;;  %v4129_v1 = vld [vmem:[#allocation5 + $0x24c] ss:$16 sps:$4 sm:$0xff]  }
  0xed   : > { %2154 = vmatpush2.bf16.msra.mxu0 %v4058_v2  ;;  %v4124_v2 = vld [vmem:[#allocation5 + $0x48] ss:$16 sps:$4 sm:$0xff]  }
  0xee   : > { %2207 = vmatpush2.bf16.msra.mxu1 %v4061_v3  ;;  %2155 = vmatprep.subr.bf16.mxu0 %v4066_v4  ;;  %v4127_v3 = vld [vmem:[#allocation5 + $0x248] ss:$16 sps:$4 sm:$0xff]   ;;  %v4132_v4 = vld [vmem:[#allocation5 + $0x2c] ss:$16 sps:$4 sm:$0xff]  }
  0xef   : > { %2208 = vmatprep.subr.bf16.mxu1 %v4069_v5  ;;  %v4135_v5 = vld [vmem:[#allocation5 + $0x22c] ss:$16 sps:$4 sm:$0xff]  }
  0xf1   : > { %2156 = vmatpush2.bf16.msra.mxu0 %v4064_v6  ;;  %v4130_v6 = vld [vmem:[#allocation5 + $0x28] ss:$16 sps:$4 sm:$0xff]  }
  0xf2   : > { %2209 = vmatpush2.bf16.msra.mxu1 %v4067_v7  ;;  %2157 = vmatprep.subr.bf16.mxu0 %v4072_v10  ;;  %v4141_v7 = vld [vmem:[#allocation5 + $0x20c] ss:$16 sps:$4 sm:$0xff]   ;;  %v4136_v10 = vld [vmem:[#allocation5 + $0x8] ss:$16 sps:$4 sm:$0xff]  }
  0xf3   : > { %2210 = vmatprep.subr.bf16.mxu1 %v4075_v11  ;;  %v4139_v11 = vld [vmem:[#allocation5 + $0x208] ss:$16 sps:$4 sm:$0xff]  }
  0xf5   : > { %2158 = vmatpush2.bf16.msra.mxu0 %v4070_v12  ;;  %v4144_v12 = vld [vmem:[#allocation5 + $0x1ec] ss:$16 sps:$4 sm:$0xff]  }
  0xf6   : > { %2211 = vmatpush2.bf16.msra.mxu1 %v4073_v13  ;;  %2159 = vmatprep.subr.bf16.mxu0 %v4078_v14  ;;  %v4147_v13 = vld [vmem:[#allocation5 + $0x3ec] ss:$16 sps:$4 sm:$0xff]   ;;  %v4142_v14 = vld [vmem:[#allocation5 + $0x1e8] ss:$16 sps:$4 sm:$0xff]  }
  0xf7   : > { %2212 = vmatprep.subr.bf16.mxu1 %v4081_v15  ;;  %v4145_v15 = vld [vmem:[#allocation5 + $0x3e8] ss:$16 sps:$4 sm:$0xff]  }
  0xf9   : > { %2160 = vmatpush2.bf16.msra.mxu0 %v4076_v16  ;;  %v4150_v16 = vld [vmem:[#allocation5 + $0x1cc] ss:$16 sps:$4 sm:$0xff]  }
  0xfa   : > { %2213 = vmatpush2.bf16.msra.mxu1 %v4079_v17  ;;  %2161 = vmatprep.subr.bf16.mxu0 %v4084_v18  ;;  %v4153_v17 = vld [vmem:[#allocation5 + $0x3cc] ss:$16 sps:$4 sm:$0xff]   ;;  %v4148_v18 = vld [vmem:[#allocation5 + $0x1c8] ss:$16 sps:$4 sm:$0xff]  }
  0xfb   : > { %2214 = vmatprep.subr.bf16.mxu1 %v4087_v19  ;;  %v4151_v19 = vld [vmem:[#allocation5 + $0x3c8] ss:$16 sps:$4 sm:$0xff]  }
  0xfd   : > { %2162 = vmatpush2.bf16.msra.mxu0 %v4082_v20  ;;  %v4156_v20 = vld [vmem:[#allocation5 + $0x1ac] ss:$16 sps:$4 sm:$0xff]  }
  0xfe   : > { %2215 = vmatpush2.bf16.msra.mxu1 %v4085_v21  ;;  %2163 = vmatprep.subr.bf16.mxu0 %v4090_v22  ;;  %v4159_v21 = vld [vmem:[#allocation5 + $0x3ac] ss:$16 sps:$4 sm:$0xff]   ;;  %v4154_v22 = vld [vmem:[#allocation5 + $0x1a8] ss:$16 sps:$4 sm:$0xff]  }
  0xff   : > { %2216 = vmatprep.subr.bf16.mxu1 %v4093_v23  ;;  %v4157_v23 = vld [vmem:[#allocation5 + $0x3a8] ss:$16 sps:$4 sm:$0xff]  }
 0x101   : > { %2164 = vmatpush2.bf16.msra.mxu0 %v4088_v24  ;;  %v4162_v24 = vld [vmem:[#allocation5 + $0x18c] ss:$16 sps:$4 sm:$0xff]  }
 0x102   : > { %2217 = vmatpush2.bf16.msra.mxu1 %v4091_v25  ;;  %2239 = vmatprep.subr.bf16.mxu0 %v4096_v26  ;;  %v4165_v25 = vld [vmem:[#allocation5 + $0x38c] ss:$16 sps:$4 sm:$0xff]   ;;  %v4160_v26 = vld [vmem:[#allocation5 + $0x188] ss:$16 sps:$4 sm:$0xff]  }
 0x103   : > { %2292 = vmatprep.subr.bf16.mxu1 %v4099_v27  ;;  %v4163_v27 = vld [vmem:[#allocation5 + $0x388] ss:$16 sps:$4 sm:$0xff]  }
 0x104   : > { %2166 = vmatmul.mubr.bf16.vlgmr.msra.gmra.mxu0 %v4905_v32 }
 0x105   : > { %2219 = vmatmul.mubr.bf16.vlgmr.msra.gmra.mxu1 %v4909_v36  ;;  %2240 = vmatpush1.bf16.msra.mxu0 %v4094_v28  ;;  %v4168_v28 = vld [vmem:[#allocation5 + $0x16c] ss:$16 sps:$4 sm:$0xff]  }
 0x106   : > { %2293 = vmatpush1.bf16.msra.mxu1 %v4097_v29  ;;  %2241 = vmatprep.subr.bf16.mxu0 %v4102_v40  ;;  %v4171_v29 = vld [vmem:[#allocation5 + $0x36c] ss:$16 sps:$4 sm:$0xff]   ;;  %v4172_v40 = vld [vmem:[#allocation5 + $0x148] ss:$16 sps:$4 sm:$0xff]  }
 0x107   : > { %2294 = vmatprep.subr.bf16.mxu1 %v4105_v41  ;;  %2175 = vmatprep.mubr.bf16.mxu0 %v4913_v42  ;;  %v4175_v41 = vld [vmem:[#allocation5 + $0x348] ss:$16 sps:$4 sm:$0xff]  }
 0x108   : > { %2228 = vmatprep.mubr.bf16.mxu1 %v4915_v43 }
 0x109   : > { %2242 = vmatpush1.bf16.msra.mxu0 %v4100_v44  ;;  %v4180_v44 = vld [vmem:[#allocation5 + $0x12c] ss:$16 sps:$4 sm:$0xff]  }
 0x10a   : > { %2295 = vmatpush1.bf16.msra.mxu1 %v4103_v45  ;;  %2243 = vmatprep.subr.bf16.mxu0 %v4108_v46  ;;  %v4183_v45 = vld [vmem:[#allocation5 + $0x32c] ss:$16 sps:$4 sm:$0xff]   ;;  %v4178_v46 = vld [vmem:[#allocation5 + $0x128] ss:$16 sps:$4 sm:$0xff]  }
 0x10b   : > { %2296 = vmatprep.subr.bf16.mxu1 %v4111_v47  ;;  %v4181_v47 = vld [vmem:[#allocation5 + $0x328] ss:$16 sps:$4 sm:$0xff]  }
 0x10c   : > { %2176 = vmatmul.mubr.bf16.gmra.mxu0 %v4921_v48 }
 0x10d   : > { %2229 = vmatmul.mubr.bf16.gmra.mxu1 %v4923_v54  ;;  %2244 = vmatpush1.bf16.msra.mxu0 %v4106_v50  ;;  %v4186_v50 = vld [vmem:[#allocation5 + $0x10c] ss:$16 sps:$4 sm:$0xff]  }
 0x10e   : > { %2297 = vmatpush1.bf16.msra.mxu1 %v4109_v52  ;;  %2245 = vmatprep.subr.bf16.mxu0 %v4114_v56  ;;  %v4189_v52 = vld [vmem:[#allocation5 + $0x30c] ss:$16 sps:$4 sm:$0xff]   ;;  %v4184_v56 = vld [vmem:[#allocation5 + $0x108] ss:$16 sps:$4 sm:$0xff]  }
 0x10f   : > { %2298 = vmatprep.subr.bf16.mxu1 %v4117_v57  ;;  %2271 = vmatprep.mubr.bf16.mxu0 %v4851_v53  ;;  %v4133_v53 = vld [vmem:[#allocation5 + $0x228] ss:$16 sps:$4 sm:$0xff]  }
 0x110   : > { %2324 = vmatprep.mubr.bf16.mxu1 %v4853_v55  ;;  %v4138_v55 = vld [vmem:[#allocation5 + $0xc] ss:$16 sps:$4 sm:$0xff]   ;;  %v4187_v57 = vld [vmem:[#allocation5 + $0x308] ss:$16 sps:$4 sm:$0xff]  }
 0x111   : > { %2246 = vmatpush1.bf16.msra.mxu0 %v4112_v58  ;;  %v4192_v58 = vld [vmem:[#allocation5 + $0x4ec] ss:$16 sps:$4 sm:$0xff]  }
 0x112   : > { %2299 = vmatpush1.bf16.msra.mxu1 %v4115_v59  ;;  %2247 = vmatprep.subr.bf16.mxu0 %v4120_v60  ;;  %v4195_v59 = vld [vmem:[#allocation5 + $0x6ec] ss:$16 sps:$4 sm:$0xff]   ;;  %v4190_v60 = vld [vmem:[#allocation5 + $0x4e8] ss:$16 sps:$4 sm:$0xff]  }
 0x113   : > { %2300 = vmatprep.subr.bf16.mxu1 %v4123_v61  ;;  %v4193_v61 = vld [vmem:[#allocation5 + $0x6e8] ss:$16 sps:$4 sm:$0xff]  }
 0x115   : > { %2248 = vmatpush1.bf16.msra.mxu0 %v4118_v62  ;;  %v4198_v62 = vld [vmem:[#allocation5 + $0x4cc] ss:$16 sps:$4 sm:$0xff]  }
 0x116   : > { %2301 = vmatpush1.bf16.msra.mxu1 %v4121_v63  ;;  %2249 = vmatprep.subr.bf16.mxu0 %v4126_v0  ;;  %v4201_v63 = vld [vmem:[#allocation5 + $0x6cc] ss:$16 sps:$4 sm:$0xff]   ;;  %v4196_v0 = vld [vmem:[#allocation5 + $0x4c8] ss:$16 sps:$4 sm:$0xff]  }
 0x117   : > { %2302 = vmatprep.subr.bf16.mxu1 %v4129_v1  ;;  %v4199_v1 = vld [vmem:[#allocation5 + $0x6c8] ss:$16 sps:$4 sm:$0xff]  }
 0x119   : > { %2250 = vmatpush1.bf16.msra.mxu0 %v4124_v2  ;;  %v4204_v2 = vld [vmem:[#allocation5 + $0x4ac] ss:$16 sps:$4 sm:$0xff]  }
 0x11a   : > { %2303 = vmatpush1.bf16.msra.mxu1 %v4127_v3  ;;  %2251 = vmatprep.subr.bf16.mxu0 %v4132_v4  ;;  %v4207_v3 = vld [vmem:[#allocation5 + $0x6ac] ss:$16 sps:$4 sm:$0xff]   ;;  %v4202_v4 = vld [vmem:[#allocation5 + $0x4a8] ss:$16 sps:$4 sm:$0xff]  }
 0x11b   : > { %2304 = vmatprep.subr.bf16.mxu1 %v4135_v5  ;;  %v4205_v5 = vld [vmem:[#allocation5 + $0x6a8] ss:$16 sps:$4 sm:$0xff]  }
 0x11d   : > { %2252 = vmatpush1.bf16.msra.mxu0 %v4130_v6  ;;  %v4210_v6 = vld [vmem:[#allocation5 + $0x48c] ss:$16 sps:$4 sm:$0xff]  }
 0x11e   : > { %2305 = vmatpush1.bf16.msra.mxu1 %v4133_v53  ;;  %2253 = vmatprep.subr.bf16.mxu0 %v4138_v55  ;;  %v4208_v53 = vld [vmem:[#allocation5 + $0x488] ss:$16 sps:$4 sm:$0xff]   ;;  %v4216_v55 = vld [vmem:[#allocation5 + $0x46c] ss:$16 sps:$4 sm:$0xff]  }
 0x11f   : > { %2306 = vmatprep.subr.bf16.mxu1 %v4141_v7  ;;  %v4214_v7 = vld [vmem:[#allocation5 + $0x468] ss:$16 sps:$4 sm:$0xff]  }
 0x121   : > { %2254 = vmatpush1.bf16.msra.mxu0 %v4136_v10  ;;  %v4222_v10 = vld [vmem:[#allocation5 + $0x44c] ss:$16 sps:$4 sm:$0xff]  }
 0x122   : > { %2307 = vmatpush1.bf16.msra.mxu1 %v4139_v11  ;;  %2255 = vmatprep.subr.bf16.mxu0 %v4144_v12  ;;  %v4225_v11 = vld [vmem:[#allocation5 + $0x64c] ss:$16 sps:$4 sm:$0xff]   ;;  %v4223_v12 = vld [vmem:[#allocation5 + $0x648] ss:$16 sps:$4 sm:$0xff]  }
 0x123   : > { %2308 = vmatprep.subr.bf16.mxu1 %v4147_v13  ;;  %v4231_v13 = vld [vmem:[#allocation5 + $0x62c] ss:$16 sps:$4 sm:$0xff]  }
 0x125   : > { %2256 = vmatpush2.bf16.msra.mxu0 %v4142_v14  ;;  %v4226_v14 = vld [vmem:[#allocation5 + $0x428] ss:$16 sps:$4 sm:$0xff]  }
 0x126   : > { %2309 = vmatpush2.bf16.msra.mxu1 %v4145_v15  ;;  %2257 = vmatprep.subr.bf16.mxu0 %v4150_v16  ;;  %v4229_v15 = vld [vmem:[#allocation5 + $0x628] ss:$16 sps:$4 sm:$0xff]   ;;  %v4234_v16 = vld [vmem:[#allocation5 + $0x40c] ss:$16 sps:$4 sm:$0xff]  }
 0x127   : > { %2310 = vmatprep.subr.bf16.mxu1 %v4153_v17  ;;  %v4235_v17 = vld [vmem:[#allocation5 + $0x608] ss:$16 sps:$4 sm:$0xff]  }
 0x129   : > { %2258 = vmatpush2.bf16.msra.mxu0 %v4148_v18  ;;  %v4240_v18 = vld [vmem:[#allocation5 + $0x5ec] ss:$16 sps:$4 sm:$0xff]  }
 0x12a   : > { %2311 = vmatpush2.bf16.msra.mxu1 %v4151_v19  ;;  %2259 = vmatprep.subr.bf16.mxu0 %v4156_v20  ;;  %v4243_v19 = vld [vmem:[#allocation5 + $0x7ec] ss:$16 sps:$4 sm:$0xff]   ;;  %v4238_v20 = vld [vmem:[#allocation5 + $0x5e8] ss:$16 sps:$4 sm:$0xff]  }
 0x12b   : > { %2312 = vmatprep.subr.bf16.mxu1 %v4159_v21  ;;  %v4241_v21 = vld [vmem:[#allocation5 + $0x7e8] ss:$16 sps:$4 sm:$0xff]  }
 0x12d   : > { %2260 = vmatpush2.bf16.msra.mxu0 %v4154_v22  ;;  %v4246_v22 = vld [vmem:[#allocation5 + $0x5cc] ss:$16 sps:$4 sm:$0xff]  }
 0x12e   : > { %2313 = vmatpush2.bf16.msra.mxu1 %v4157_v23  ;;  %2261 = vmatprep.subr.bf16.mxu0 %v4162_v24  ;;  %v4249_v23 = vld [vmem:[#allocation5 + $0x7cc] ss:$16 sps:$4 sm:$0xff]   ;;  %v4244_v24 = vld [vmem:[#allocation5 + $0x5c8] ss:$16 sps:$4 sm:$0xff]  }
 0x12f   : > { %2314 = vmatprep.subr.bf16.mxu1 %v4165_v25  ;;  %v4247_v25 = vld [vmem:[#allocation5 + $0x7c8] ss:$16 sps:$4 sm:$0xff]  }
 0x131   : > { %2262 = vmatpush2.bf16.msra.mxu0 %v4160_v26  ;;  %v4252_v26 = vld [vmem:[#allocation5 + $0x5ac] ss:$16 sps:$4 sm:$0xff]  }
 0x132   : > { %2315 = vmatpush2.bf16.msra.mxu1 %v4163_v27  ;;  %2263 = vmatprep.subr.bf16.mxu0 %v4168_v28  ;;  %v4255_v27 = vld [vmem:[#allocation5 + $0x7ac] ss:$16 sps:$4 sm:$0xff]   ;;  %v4250_v28 = vld [vmem:[#allocation5 + $0x5a8] ss:$16 sps:$4 sm:$0xff]  }
 0x133   : > { %2316 = vmatprep.subr.bf16.mxu1 %v4171_v29  ;;  %v4253_v29 = vld [vmem:[#allocation5 + $0x7a8] ss:$16 sps:$4 sm:$0xff]  }
 0x135   : > { %2264 = vmatpush2.bf16.msra.mxu0 %v4166_v30  ;;  %v4258_v30 = vld [vmem:[#allocation5 + $0x58c] ss:$16 sps:$4 sm:$0xff]  }
 0x136   : > { %2317 = vmatpush2.bf16.msra.mxu1 %v4169_v31  ;;  %2265 = vmatprep.subr.bf16.mxu0 %v4174_v38  ;;  %v4261_v31 = vld [vmem:[#allocation5 + $0x78c] ss:$16 sps:$4 sm:$0xff]   ;;  %v4256_v38 = vld [vmem:[#allocation5 + $0x588] ss:$16 sps:$4 sm:$0xff]  }
 0x137   : > { %2318 = vmatprep.subr.bf16.mxu1 %v4177_v39  ;;  %v4259_v39 = vld [vmem:[#allocation5 + $0x788] ss:$16 sps:$4 sm:$0xff]  }
 0x139   : > { %2266 = vmatpush2.bf16.msra.mxu0 %v4172_v40  ;;  %v4264_v40 = vld [vmem:[#allocation5 + $0x56c] ss:$16 sps:$4 sm:$0xff]  }
 0x13a   : > { %2319 = vmatpush2.bf16.msra.mxu1 %v4175_v41  ;;  %2267 = vmatprep.subr.bf16.mxu0 %v4180_v44  ;;  %v4267_v41 = vld [vmem:[#allocation5 + $0x76c] ss:$16 sps:$4 sm:$0xff]   ;;  %v4262_v44 = vld [vmem:[#allocation5 + $0x568] ss:$16 sps:$4 sm:$0xff]  }
 0x13b   : > { %2320 = vmatprep.subr.bf16.mxu1 %v4183_v45  ;;  %v4265_v45 = vld [vmem:[#allocation5 + $0x768] ss:$16 sps:$4 sm:$0xff]  }
 0x13d   : > { %2268 = vmatpush2.bf16.msra.mxu0 %v4178_v46  ;;  %v4270_v46 = vld [vmem:[#allocation5 + $0x54c] ss:$16 sps:$4 sm:$0xff]  }
 0x13e   : > { %2321 = vmatpush2.bf16.msra.mxu1 %v4181_v47  ;;  %2269 = vmatprep.subr.bf16.mxu0 %v4186_v50  ;;  %v4273_v47 = vld [vmem:[#allocation5 + $0x74c] ss:$16 sps:$4 sm:$0xff]   ;;  %v4268_v50 = vld [vmem:[#allocation5 + $0x548] ss:$16 sps:$4 sm:$0xff]  }
 0x13f   : > { %2322 = vmatprep.subr.bf16.mxu1 %v4189_v52  ;;  %v4271_v52 = vld [vmem:[#allocation5 + $0x748] ss:$16 sps:$4 sm:$0xff]  }
 0x141   : > { %2270 = vmatpush2.bf16.msra.mxu0 %v4184_v56  ;;  %v4276_v56 = vld [vmem:[#allocation5 + $0x52c] ss:$16 sps:$4 sm:$0xff]  }
 0x142   : > { %2323 = vmatpush2.bf16.msra.mxu1 %v4187_v57  ;;  %2345 = vmatprep.subr.bf16.mxu0 %v4192_v58  ;;  %v4279_v57 = vld [vmem:[#allocation5 + $0x72c] ss:$16 sps:$4 sm:$0xff]   ;;  %v4274_v58 = vld [vmem:[#allocation5 + $0x528] ss:$16 sps:$4 sm:$0xff]  }
 0x143   : > { %2398 = vmatprep.subr.bf16.mxu1 %v4195_v59  ;;  %v4277_v59 = vld [vmem:[#allocation5 + $0x728] ss:$16 sps:$4 sm:$0xff]  }
 0x144   : > { %2272 = vmatmul.mubr.bf16.vlgmr.msra.gmra.mxu0 %v4857_v8  ;;  %v4213_v8 = vld [vmem:[#allocation5 + $0x68c] ss:$16 sps:$4 sm:$0xff]  }
 0x145   : > { %2325 = vmatmul.mubr.bf16.vlgmr.msra.gmra.mxu1 %v4859_v9  ;;  %2346 = vmatpush1.bf16.msra.mxu0 %v4190_v60  ;;  %v4211_v9 = vld [vmem:[#allocation5 + $0x688] ss:$16 sps:$4 sm:$0xff]   ;;  %v4282_v60 = vld [vmem:[#allocation5 + $0x50c] ss:$16 sps:$4 sm:$0xff]  }
 0x146   : > { %2399 = vmatpush1.bf16.msra.mxu1 %v4193_v61  ;;  %2347 = vmatprep.subr.bf16.mxu0 %v4198_v62  ;;  %v4285_v61 = vld [vmem:[#allocation5 + $0x70c] ss:$16 sps:$4 sm:$0xff]   ;;  %v4280_v62 = vld [vmem:[#allocation5 + $0x508] ss:$16 sps:$4 sm:$0xff]  }
 0x147   : > { %2400 = vmatprep.subr.bf16.mxu1 %v4201_v63  ;;  %2281 = vmatprep.mubr.bf16.mxu0 %v4867_v33  ;;  %v4219_v33 = vld [vmem:[#allocation5 + $0x66c] ss:$16 sps:$4 sm:$0xff]   ;;  %v4283_v63 = vld [vmem:[#allocation5 + $0x708] ss:$16 sps:$4 sm:$0xff]  }
 0x148   : > { %2334 = vmatprep.mubr.bf16.mxu1 %v4871_v35  ;;  %v4217_v35 = vld [vmem:[#allocation5 + $0x668] ss:$16 sps:$4 sm:$0xff]  }
 0x149   : > { %2348 = vmatpush1.bf16.msra.mxu0 %v4196_v0  ;;  %v4288_v0 = vld [vmem:[#allocation8 + $0x74] ss:$8 sps:$4 sm:$0xff]  }
 0x14a   : > { %2401 = vmatpush1.bf16.msra.mxu1 %v4199_v1  ;;  %2349 = vmatprep.subr.bf16.mxu0 %v4204_v2  ;;  %v4286_v1 = vld [vmem:[#allocation8 + $0x70] ss:$8 sps:$4 sm:$0xff]   ;;  %v4291_v2 = vld [vmem:[#allocation8 + $0x64] ss:$8 sps:$4 sm:$0xff]  }
 0x14b   : > { %2402 = vmatprep.subr.bf16.mxu1 %v4207_v3  ;;  %v4289_v3 = vld [vmem:[#allocation8 + $0x60] ss:$8 sps:$4 sm:$0xff]  }
 0x14c   : > { %2282 = vmatmul.mubr.bf16.gmra.mxu0 %v4869_v34  ;;  %v4220_v34 = vld [vmem:[#allocation5 + $0x448] ss:$16 sps:$4 sm:$0xff]  }
 0x14d   : > { %2335 = vmatmul.mubr.bf16.gmra.mxu1 %v4873_v37  ;;  %2350 = vmatpush1.bf16.msra.mxu0 %v4202_v4  ;;  %v4228_v37 = vld [vmem:[#allocation5 + $0x42c] ss:$16 sps:$4 sm:$0xff]   ;;  %v4294_v4 = vld [vmem:[#allocation8 + $0x54] ss:$8 sps:$4 sm:$0xff]  }
 0x14e   : > { %2403 = vmatpush1.bf16.msra.mxu1 %v4205_v5  ;;  %2351 = vmatprep.subr.bf16.mxu0 %v4210_v6  ;;  %v4292_v5 = vld [vmem:[#allocation8 + $0x50] ss:$8 sps:$4 sm:$0xff]   ;;  %v4297_v6 = vld [vmem:[#allocation8 + $0x44] ss:$8 sps:$4 sm:$0xff]  }
 0x14f   : > { %2404 = vmatprep.subr.bf16.mxu1 %v4213_v8  ;;  %2377 = vmatprep.mubr.bf16.mxu0 %v4890_v49  ;;  %v4237_v49 = vld [vmem:[#allocation5 + $0x60c] ss:$16 sps:$4 sm:$0xff]  }
 0x150   : > { %2430 = vmatprep.mubr.bf16.mxu1 %v4897_v51  ;;  %v4232_v51 = vld [vmem:[#allocation5 + $0x408] ss:$16 sps:$4 sm:$0xff]   ;;  %v4334_v8 = vld [vmem:[#allocation8 + $0x170] ss:$8 sps:$4 sm:$0xff]  }
 0x151   : > { %2352 = vmatpush1.bf16.msra.mxu0 %v4208_v53  ;;  %v4339_v53 = vld [vmem:[#allocation8 + $0x164] ss:$8 sps:$4 sm:$0xff]  }
 0x152   : > { %2405 = vmatpush1.bf16.msra.mxu1 %v4211_v9  ;;  %2353 = vmatprep.subr.bf16.mxu0 %v4216_v55  ;;  %v4342_v9 = vld [vmem:[#allocation8 + $0x154] ss:$8 sps:$4 sm:$0xff]   ;;  %v4298_v55 = vld [vmem:[#allocation8 + $0x30] ss:$8 sps:$4 sm:$0xff]  }
 0x153   : > { %2406 = vmatprep.subr.bf16.mxu1 %v4219_v33  ;;  %v4303_v33 = vld [vmem:[#allocation8 + $0x24] ss:$8 sps:$4 sm:$0xff]  }
 0x155   : > { %2354 = vmatpush1.bf16.msra.mxu0 %v4214_v7  ;;  %v4301_v7 = vld [vmem:[#allocation8 + $0x20] ss:$8 sps:$4 sm:$0xff]  }
 0x156   : > { %2407 = vmatpush1.bf16.msra.mxu1 %v4217_v35  ;;  %2355 = vmatprep.subr.bf16.mxu0 %v4222_v10  ;;  %v4306_v35 = vld [vmem:[#allocation8 + $0x14] ss:$8 sps:$4 sm:$0xff]   ;;  %v4343_v10 = vld [vmem:[#allocation8 + $0x140] ss:$8 sps:$4 sm:$0xff]  }
 0x157   : > { %2408 = vmatprep.subr.bf16.mxu1 %v4225_v11  ;;  %v4348_v11 = vld [vmem:[#allocation8 + $0x134] ss:$8 sps:$4 sm:$0xff]  }
 0x159   : > { %2356 = vmatpush1.bf16.msra.mxu0 %v4220_v34  ;;  %v4304_v34 = vld [vmem:[#allocation8 + $0x10] ss:$8 sps:$4 sm:$0xff]  }
 0x15a   : > { %2409 = vmatpush1.bf16.msra.mxu1 %v4223_v12  ;;  %2357 = vmatprep.subr.bf16.mxu0 %v4228_v37  ;;  %v4309_v12 = vld [vmem:[#allocation8 + $0x4] ss:$8 sps:$4 sm:$0xff]   ;;  %v4346_v37 = vld [vmem:[#allocation8 + $0x130] ss:$8 sps:$4 sm:$0xff]  }
 0x15b   : > { %2410 = vmatprep.subr.bf16.mxu1 %v4231_v13  ;;  %v4351_v13 = vld [vmem:[#allocation8 + $0x124] ss:$8 sps:$4 sm:$0xff]  }
 0x15d   : > { %2358 = vmatpush1.bf16.msra.mxu0 %v4226_v14  ;;  %v4307_v14 = vld [vmem:[#allocation8] ss:$8 sps:$4 sm:$0xff]  }
 0x15e   : > { %2411 = vmatpush1.bf16.msra.mxu1 %v4229_v15  ;;  %2359 = vmatprep.subr.bf16.mxu0 %v4234_v16  ;;  %v4312_v15 = vld [vmem:[#allocation8 + $0xf4] ss:$8 sps:$4 sm:$0xff]   ;;  %v4349_v16 = vld [vmem:[#allocation8 + $0x120] ss:$8 sps:$4 sm:$0xff]  }
 0x15f   : > { %2412 = vmatprep.subr.bf16.mxu1 %v4237_v49  ;;  %v4354_v49 = vld [vmem:[#allocation8 + $0x114] ss:$8 sps:$4 sm:$0xff]  }
 0x161   : > { %2360 = vmatpush1.bf16.msra.mxu0 %v4232_v51  ;;  %v4310_v51 = vld [vmem:[#allocation8 + $0xf0] ss:$8 sps:$4 sm:$0xff]  }
 0x162   : > { %2413 = vmatpush1.bf16.msra.mxu1 %v4235_v17  ;;  %2361 = vmatprep.subr.bf16.mxu0 %v4240_v18  ;;  %v4315_v17 = vld [vmem:[#allocation8 + $0xe4] ss:$8 sps:$4 sm:$0xff]   ;;  %v4352_v18 = vld [vmem:[#allocation8 + $0x110] ss:$8 sps:$4 sm:$0xff]  }
 0x163   : > { %2414 = vmatprep.subr.bf16.mxu1 %v4243_v19  ;;  %v4357_v19 = vld [vmem:[#allocation8 + $0x104] ss:$8 sps:$4 sm:$0xff]  }
 0x165   : > { %2362 = vmatpush2.bf16.msra.mxu0 %v4238_v20  ;;  %v4313_v20 = vld [vmem:[#allocation8 + $0xe0] ss:$8 sps:$4 sm:$0xff]  }
 0x166   : > { %2415 = vmatpush2.bf16.msra.mxu1 %v4241_v21  ;;  %2363 = vmatprep.subr.bf16.mxu0 %v4246_v22  ;;  %v4318_v21 = vld [vmem:[#allocation8 + $0xd4] ss:$8 sps:$4 sm:$0xff]  }
 0x167   : > { %2416 = vmatprep.subr.bf16.mxu1 %v4249_v23 }
 0x169   : > { %2364 = vmatpush2.bf16.msra.mxu0 %v4244_v24  ;;  %v4355_v24 = vld [vmem:[#allocation8 + $0x100] ss:$8 sps:$4 sm:$0xff]  }
 0x16a   : > { %2417 = vmatpush2.bf16.msra.mxu1 %v4247_v25  ;;  %2365 = vmatprep.subr.bf16.mxu0 %v4252_v26  ;;  %v4360_v25 = vld [vmem:[#allocation8 + $0x1f4] ss:$8 sps:$4 sm:$0xff]   ;;  %v4316_v26 = vld [vmem:[#allocation8 + $0xd0] ss:$8 sps:$4 sm:$0xff]  }
 0x16b   : > { %2418 = vmatprep.subr.bf16.mxu1 %v4255_v27  ;;  %v4321_v27 = vld [vmem:[#allocation8 + $0xc4] ss:$8 sps:$4 sm:$0xff]  }
 0x16d   : > { %2366 = vmatpush2.bf16.msra.mxu0 %v4250_v28 }
 0x16e   : > { %2419 = vmatpush2.bf16.msra.mxu1 %v4253_v29  ;;  %2367 = vmatprep.subr.bf16.mxu0 %v4258_v30  ;;  %v4358_v30 = vld [vmem:[#allocation8 + $0x1f0] ss:$8 sps:$4 sm:$0xff]  }
 0x16f   : > { %2420 = vmatprep.subr.bf16.mxu1 %v4261_v31  ;;  %v4363_v31 = vld [vmem:[#allocation8 + $0x1e4] ss:$8 sps:$4 sm:$0xff]  }
 0x171   : > { %2368 = vmatpush2.bf16.msra.mxu0 %v4256_v38  ;;  %v4319_v38 = vld [vmem:[#allocation8 + $0xc0] ss:$8 sps:$4 sm:$0xff]  }
 0x172   : > { %2421 = vmatpush2.bf16.msra.mxu1 %v4259_v39  ;;  %2369 = vmatprep.subr.bf16.mxu0 %v4264_v40  ;;  %v4324_v39 = vld [vmem:[#allocation8 + $0xb4] ss:$8 sps:$4 sm:$0xff]  }
 0x173   : > { %2422 = vmatprep.subr.bf16.mxu1 %v4267_v41 }
 0x175   : > { %2370 = vmatpush2.bf16.msra.mxu0 %v4262_v44  ;;  %v4361_v44 = vld [vmem:[#allocation8 + $0x1e0] ss:$8 sps:$4 sm:$0xff]  }
 0x176   : > { %2423 = vmatpush2.bf16.msra.mxu1 %v4265_v45  ;;  %2371 = vmatprep.subr.bf16.mxu0 %v4270_v46  ;;  %v647_v45 = vlaneseq  ;;  %v4366_v46 = vld [vmem:[#allocation8 + $0x1d4] ss:$8 sps:$4 sm:$0xff]  }
 0x177   : > { %2424 = vmatprep.subr.bf16.mxu1 %v4273_v47  ;;  %v4322_v47 = vld [vmem:[#allocation8 + $0xb0] ss:$8 sps:$4 sm:$0xff]  }
 0x179   : > { %2372 = vmatpush2.bf16.msra.mxu0 %v4268_v50  ;;  %v4327_v50 = vld [vmem:[#allocation8 + $0xa4] ss:$8 sps:$4 sm:$0xff]  }
 0x17a   : > { %2425 = vmatpush2.bf16.msra.mxu1 %v4271_v52  ;;  %2373 = vmatprep.subr.bf16.mxu0 %v4276_v56 }
 0x17b   : > { %2426 = vmatprep.subr.bf16.mxu1 %v4279_v57  ;;  %v4364_v57 = vld [vmem:[#allocation8 + $0x1d0] ss:$8 sps:$4 sm:$0xff]  }
 0x17d   : > { %2374 = vmatpush2.bf16.msra.mxu0 %v4274_v58  ;;  %v4949_v58 = vshrl.u32 %v647_v45, 7 }
 0x17e   : > { %2427 = vmatpush2.bf16.msra.mxu1 %v4277_v59  ;;  %2375 = vmatprep.subr.bf16.mxu0 %v4282_v60  ;;  %v4369_v59 = vld [vmem:[#allocation8 + $0x1c4] ss:$8 sps:$4 sm:$0xff]  }
 0x17f   : > { %2428 = vmatprep.subr.bf16.mxu1 %v4285_v61 }
 0x181   : > { %2376 = vmatpush2.bf16.msra.mxu0 %v4280_v62  ;;  %v4325_v62 = vld [vmem:[#allocation8 + $0xa0] ss:$8 sps:$4 sm:$0xff]  }
 0x182   : > { %2429 = vmatpush2.bf16.msra.mxu1 %v4283_v63  ;;  %2871 = vmatprep.subr.bf16.mxu0 %v4288_v0  ;;  %v4330_v63 = vld [vmem:[#allocation8 + $0x94] ss:$8 sps:$4 sm:$0xff]   ;;  %v4367_v0 = vld [vmem:[#allocation8 + $0x1c0] ss:$8 sps:$4 sm:$0xff]  }
 0x184   : > { %2378 = vmatmul.mubr.bf16.vlgmr.msra.gmra.mxu0 %v4905_v32  ;;  %v4336_v32 = vld [vmem:[#allocation8 + $0x174] ss:$8 sps:$4 sm:$0xff]   ;;  %v4943_v22 = vpop.f32.mrf.mxu0 }
 0x185   : > { %2431 = vmatmul.mubr.bf16.vlgmr.msra.gmra.mxu1 %v4909_v36  ;;  %2387 = vmatprep.mubr.bf16.mxu0 %v4913_v42  ;;  %v4295_v36 = vld [vmem:[#allocation8 + $0x40] ss:$8 sps:$4 sm:$0xff]   ;;  %v4300_v42 = vld [vmem:[#allocation8 + $0x34] ss:$8 sps:$4 sm:$0xff]   ;;  %v4945_v23 = vpop.f32.mrf.mxu1 }
 0x186   : > { %2440 = vmatprep.mubr.bf16.mxu1 %v4915_v43  ;;  %2872 = vmatpush1.bf16.msra.mxu0 %v4286_v1  ;;  %v4337_v43 = vld [vmem:[#allocation8 + $0x160] ss:$8 sps:$4 sm:$0xff]   ;;  %v2063_v28 = vpop.f32.mrf.mxu0  ;;  %v653_v1 = vsub.s32 1, %v4949_v58 }
 0x187   : > { %2873 = vmatprep.subr.bf16.mxu0 %v4291_v2  ;;  %2924 = vmatprep.subr.bf16.mxu1 %v4336_v32  ;;  %v4947_v29 = vpop.f32.mrf.mxu1  ;;  %v4954_v2 = vld [vmem:[#allocation7] sm:$0xf] }
 0x188   : > { %2925 = vmatpush1.bf16.msra.mxu1 %v4334_v8  ;;  %v2065_v40 = vpop.f32.mrf.mxu0  ;;  %v4333_v8 = vld [vmem:[#allocation8 + $0x84] ss:$8 sps:$4 sm:$0xff]   ;;  %v654_v32 = vrot.slane %v4954_v2, %v653_v1 }
 0x189   : > { %2926 = vmatprep.subr.bf16.mxu1 %v4339_v53  ;;  %v2118_v41 = vpop.f32.mrf.mxu1 }
 0x18a   : > { %2874 = vmatpush1.bf16.msra.mxu0 %v4289_v3  ;;  %v2067_v52 = vpop.f32.mrf.mxu0  ;;  %v649_v3 = vsub.s32 0, %v4949_v58 }
 0x18b   : > { %2875 = vmatprep.subr.bf16.mxu0 %v4294_v4  ;;  %v2120_v56 = vpop.f32.mrf.mxu1 }
 0x18c   : > { %2388 = vmatmul.mubr.bf16.gmra.mxu0 %v4921_v48  ;;  %2927 = vmatpush1.bf16.msra.mxu1 %v4337_v43  ;;  %v4340_v48 = vld [vmem:[#allocation8 + $0x150] ss:$8 sps:$4 sm:$0xff]   ;;  %v2071_v60 = vpop.f32.mrf.mxu0  ;;  %v4331_v43 = vld [vmem:[#allocation8 + $0x80] ss:$8 sps:$4 sm:$0xff]  }
 0x18d   : > { %2441 = vmatmul.mubr.bf16.gmra.mxu1 %v4923_v54  ;;  %2928 = vmatprep.subr.bf16.mxu1 %v4342_v9  ;;  %v4345_v54 = vld [vmem:[#allocation8 + $0x144] ss:$8 sps:$4 sm:$0xff]   ;;  %v4951_v61 = vpop.f32.mrf.mxu1  ;;  %v2064_v9 = vadd.f32 %v2063_v28, %v654_v32 }
 0x18e   : > { %2876 = vmatpush1.bf16.msra.mxu0 %v4292_v5  ;;  %v2073_v4 = vpop.f32.mrf.mxu0 }
 0x18f   : > { %2877 = vmatprep.subr.bf16.mxu0 %v4297_v6  ;;  %v2126_v5 = vpop.f32.mrf.mxu1  ;;  %v4328_v6 = vld [vmem:[#allocation8 + $0x90] ss:$8 sps:$4 sm:$0xff]  }
 0x190   : > { %2929 = vmatpush1.bf16.msra.mxu1 %v4340_v48  ;;  %v2075_v53 = vpop.f32.mrf.mxu0 }
 0x191   : > { %2930 = vmatprep.subr.bf16.mxu1 %v4345_v54  ;;  %v4372_v54 = vld [vmem:[#allocation8 + $0x1b4] ss:$8 sps:$4 sm:$0xff]  }
 0x192   : > { %2878 = vmatpush1.bf16.msra.mxu0 %v4295_v36  ;;  %v650_v36 = vrot.slane %v4954_v2, %v649_v3 }
 0x193   : > { %2879 = vmatprep.subr.bf16.mxu0 %v4300_v42  ;;  %v2128_v42 = vpop.f32.mrf.mxu1 }
 0x194   : > { %2931 = vmatpush1.bf16.msra.mxu1 %v4343_v10  ;;  %v2076_v28 = vadd.f32 %v2075_v53, %v650_v36 }
 0x195   : > { %2932 = vmatprep.subr.bf16.mxu1 %v4348_v11  ;;  %v2130_v48 = vpop.f32.mrf.mxu1 }
 0x196   : > { %2880 = vmatpush1.bf16.msra.mxu0 %v4298_v55  ;;  %v2062_v55 = vadd.f32 %v4943_v22, %v650_v36 }
 0x197   : > { %2881 = vmatprep.subr.bf16.mxu0 %v4303_v33  ;;  %v2077_v33 = vpop.f32.mrf.mxu0 }
 0x198   : > { %2933 = vmatpush1.bf16.msra.mxu1 %v4346_v37  ;;  %v2115_v37 = vadd.f32 %v4945_v23, %v2062_v55 }
 0x199   : > { %2934 = vmatprep.subr.bf16.mxu1 %v4351_v13 }
 0x19a   : > { %2882 = vmatpush1.bf16.msra.mxu0 %v4301_v7  ;;  %v2066_v7 = vadd.f32 %v2065_v40, %v650_v36 }
 0x19b   : > { %2883 = vmatprep.subr.bf16.mxu0 %v4306_v35  ;;  %v4370_v35 = vld [vmem:[#allocation8 + $0x1b0] ss:$8 sps:$4 sm:$0xff]  }
 0x19c   : > { %2935 = vmatpush1.bf16.msra.mxu1 %v4349_v16  ;;  %v2119_v16 = vadd.f32 %v2118_v41, %v2066_v7 }
 0x19d   : > { %2936 = vmatprep.subr.bf16.mxu1 %v4354_v49 }
 0x19e   : > { %2884 = vmatpush1.bf16.msra.mxu0 %v4304_v34  ;;  %v2117_v34 = vadd.f32 %v4947_v29, %v2064_v9 }
 0x19f   : > { %2885 = vmatprep.subr.bf16.mxu0 %v4309_v12  ;;  %v2068_v12 = vadd.f32 %v2067_v52, %v654_v32 }
 0x1a0   : > { %2937 = vmatpush1.bf16.msra.mxu1 %v4352_v18 }
 0x1a1   : > { %2938 = vmatprep.subr.bf16.mxu1 %v4357_v19 }
 0x1a2   : > { %2886 = vmatpush1.bf16.msra.mxu0 %v4307_v14 }
 0x1a3   : > { %2887 = vmatprep.subr.bf16.mxu0 %v4312_v15  ;;  %v4375_v15 = vld [vmem:[#allocation8 + $0x1a4] ss:$8 sps:$4 sm:$0xff]  }
 0x1a4   : > { %2939 = vmatpush1.bf16.msra.mxu1 %v4355_v24  ;;  %v2072_v24 = vadd.f32 %v2071_v60, %v650_v36 }
 0x1a5   : > { %2940 = vmatprep.subr.bf16.mxu1 %v4360_v25 }
 0x1a6   : > { %2888 = vmatpush2.bf16.msra.mxu0 %v4310_v51  ;;  %v4373_v51 = vld [vmem:[#allocation8 + $0x1a0] ss:$8 sps:$4 sm:$0xff]  }
 0x1a7   : > { %2889 = vmatprep.subr.bf16.mxu0 %v4315_v17 }
 0x1a8   : > { %2941 = vmatpush2.bf16.msra.mxu1 %v4358_v30 }
 0x1a9   : > { %2942 = vmatprep.subr.bf16.mxu1 %v4363_v31  ;;  %v4376_v31 = vld [vmem:[#allocation8 + $0x190] ss:$8 sps:$4 sm:$0xff]  }
 0x1aa   : > { %2890 = vmatpush2.bf16.msra.mxu0 %v4313_v20  ;;  %v2121_v20 = vadd.f32 %v2120_v56, %v2068_v12  ;;  %v4381_v56 = vld [vmem:[#allocation8 + $0x184] ss:$8 sps:$4 sm:$0xff]  }
 0x1ab   : > { %2891 = vmatprep.subr.bf16.mxu0 %v4318_v21  ;;  %v2074_v21 = vadd.f32 %v2073_v4, %v654_v32 }
 0x1ac   : > { %2943 = vmatpush2.bf16.msra.mxu1 %v4361_v44  ;;  %v2078_v44 = vadd.f32 %v2077_v33, %v654_v32 }
 0x1ad   : > { %2944 = vmatprep.subr.bf16.mxu1 %v4366_v46  ;;  %v2127_v41 = vadd.f32 %v2126_v5, %v2074_v21  ;;  %v2125_v46 = vadd.f32 %v4951_v61, %v2072_v24  ;;  %v4987_v21 = vld [vmem:[#allocation10 + $0x58] sm:$0xff]  }
 0x1ae   : > { %2892 = vmatpush2.bf16.msra.mxu0 %v4316_v26  ;;  %v2131_v5 = vadd.f32 %v2130_v48, %v2078_v44  ;;  %v4382_v48 = vld [vmem:[#allocation10 + $0x78] sm:$0xff]  }
 0x1af   : > { %2893 = vmatprep.subr.bf16.mxu0 %v4321_v27  ;;  %v4378_v27 = vld [vmem:[#allocation8 + $0x194] ss:$8 sps:$4 sm:$0xff]  }
 0x1b0   : > { %2945 = vmatpush2.bf16.msra.mxu1 %v4364_v57  ;;  %v2129_v57 = vadd.f32 %v2128_v42, %v2076_v28 }
 0x1b1   : > { %2946 = vmatprep.subr.bf16.mxu1 %v4369_v59 }
 0x1b2   : > { %2894 = vmatpush2.bf16.msra.mxu0 %v4319_v38 }
 0x1b3   : > { %2895 = vmatprep.subr.bf16.mxu0 %v4324_v39 }
 0x1b4   : > { %2947 = vmatpush2.bf16.msra.mxu1 %v4367_v0 }
 0x1b5   : > { %2948 = vmatprep.subr.bf16.mxu1 %v4372_v54 }
 0x1b6   : > { %2896 = vmatpush2.bf16.msra.mxu0 %v4322_v47 }
 0x1b7   : > { %2897 = vmatprep.subr.bf16.mxu0 %v4327_v50 }
 0x1b8   : > { %2949 = vmatpush2.bf16.msra.mxu1 %v4370_v35 }
 0x1b9   : > { %2950 = vmatprep.subr.bf16.mxu1 %v4375_v15  ;;  %v4975_v15 = vld [vmem:[#allocation10 + $0x68] sm:$0xff]  }
 0x1ba   : > { %2898 = vmatpush2.bf16.msra.mxu0 %v4325_v62 }
 0x1bb   : > { %2899 = vmatprep.subr.bf16.mxu0 %v4330_v63  ;;  %v4379_v63 = vld [vmem:[#allocation8 + $0x180] ss:$8 sps:$4 sm:$0xff]  }
 0x1bc   : > { %2951 = vmatpush2.bf16.msra.mxu1 %v4373_v51  ;;  %v4978_v51 = vld [vmem:[#allocation10 + $0x28] sm:$0xff]  }
 0x1bd   : > { %2952 = vmatprep.subr.bf16.mxu1 %v4378_v27 }
 0x1be   : > { %2900 = vmatpush2.bf16.msra.mxu0 %v4328_v6 }
 0x1bf   : > { %2901 = vmatprep.subr.bf16.mxu0 %v4333_v8 }
 0x1c0   : > { %2953 = vmatpush2.bf16.msra.mxu1 %v4376_v31 }
 0x1c1   : > { %2954 = vmatprep.subr.bf16.mxu1 %v4381_v56 }
 0x1c2   : > { %2902 = vmatpush2.bf16.msra.mxu0 %v4331_v43 }
 0x1c3   : > { %3768 = vmatprep.subr.bf16.mxu0 %v4382_v48 }
 0x1c4   : > { %v2167_v10 = vpop.f32.mrf.mxu0  ;;  %2955 = vmatpush2.bf16.msra.mxu1 %v4379_v63 }
 0x1c5   : > { %v2220_v11 = vpop.f32.mrf.mxu1  ;;  %v2168_v17 = vadd.f32 %v2167_v10, %v2115_v37  ;;  %v4967_v37 = vld [vmem:[#allocation10 + $0x38] sm:$0xff]   ;;  %3796 = vmatprep.subr.bf16.mxu1 %v4382_v48 }
 0x1c6   : > { %v2169_v13 = vpop.f32.mrf.mxu0 }
 0x1c7   : > { %v2222_v14 = vpop.f32.mrf.mxu1  ;;  %v2170_v49 = vadd.f32 %v2169_v13, %v2117_v34  ;;  %v2221_v38 = vadd.f32 %v2220_v11, %v2168_v17  ;;  %v4969_v13 = vld [vmem:[#allocation10 + $0x70] sm:$0xff]   ;;  %v4981_v17 = vld [vmem:[#allocation10 + $0x60] sm:$0xff]  }
 0x1c8   : > { %v2171_v18 = vpop.f32.mrf.mxu0 }
 0x1c9   : > { %v2224_v19 = vpop.f32.mrf.mxu1  ;;  %v2172_v22 = vadd.f32 %v2171_v18, %v2119_v16  ;;  %v2223_v23 = vadd.f32 %v2222_v14, %v2170_v49  ;;  %v2451_v0 = vmax.f32 %v2221_v38, 0.0  ;;  %v4972_v14 = vld [vmem:[#allocation10 + $0x30] sm:$0xff]  }
 0x1ca   : > { %v2173_v25 = vpop.f32.mrf.mxu0 }
 0x1cb   : > { %v2226_v26 = vpop.f32.mrf.mxu1  ;;  %v2225_v29 = vadd.f32 %v2224_v19, %v2172_v22  ;;  %v2174_v30 = vadd.f32 %v2173_v25, %v2121_v20  ;;  %v2452_v59 = vmax.f32 %v2223_v23, 0.0  ;;  %v4984_v20 = vld [vmem:[#allocation10 + $0x20] sm:$0xff]   ;;  %v4990_v25 = vld [vmem:[#allocation10 + $0x18] sm:$0xff]  }
 0x1cc   : > { %v2177_v39 = vpop.f32.mrf.mxu0 }
 0x1cd   : > { %v2230_v40 = vpop.f32.mrf.mxu1  ;;  %v2227_v45 = vadd.f32 %v2226_v26, %v2174_v30  ;;  %v2455_v47 = vmax.f32 %v2225_v29, 0.0  ;;  %v2178_v4 = vadd.f32 %v2177_v39, %v2125_v46  ;;  %v661_v29 = vsub.s32 3, %v4949_v58 }
 0x1ce   : > { %v2179_v50 = vpop.f32.mrf.mxu0  ;;  %v657_v30 = vsub.s32 2, %v4949_v58 }
 0x1cf   : > { %v2232_v52 = vpop.f32.mrf.mxu1  ;;  %v2456_v60 = vmax.f32 %v2227_v45, 0.0  ;;  %v2180_v62 = vadd.f32 %v2179_v50, %v2127_v41  ;;  %v2467_v53 = vpack.c.bf16 %v2455_v47, %v2451_v0  ;;  %v2231_v42 = vadd.f32 %v2230_v40, %v2178_v4 }
 0x1d0   : > { %v2181_v6 = vpop.f32.mrf.mxu0  ;;  %v662_v39 = vrot.slane %v4954_v2, %v661_v29  ;;  %v658_v40 = vrot.slane %v4954_v2, %v657_v30 }
 0x1d1   : > { %v2234_v8 = vpop.f32.mrf.mxu1  ;;  %v2468_v32 = vpack.c.bf16 %v2456_v60, %v2452_v59  ;;  %v2182_v36 = vadd.f32 %v2181_v6, %v2129_v57  ;;  %v2233_v9 = vadd.f32 %v2232_v52, %v2180_v62  ;;  %v2459_v11 = vmax.f32 %v2231_v42, 0.0 }
 0x1d2   : > { %v2183_v61 = vpop.f32.mrf.mxu0 }
 0x1d3   : > { %v2236_v43 = vpop.f32.mrf.mxu1  ;;  %v2184_v55 = vadd.f32 %v2183_v61, %v2131_v5  ;;  %v2235_v33 = vadd.f32 %v2234_v8, %v2182_v36  ;;  %2903 = vmatprep.mubr.bf16.mxu0 %v2468_v32  ;;  %v2460_v35 = vmax.f32 %v2233_v9, 0.0 }
 0x1d4   : > { %2904 = vmatmul.mubr.bf16.vlgmr.msra.gmra.mxu0 %v2467_v53 }
 0x1d5   : > { %v2237_v54 = vadd.f32 %v2236_v43, %v2184_v55  ;;  %v2463_v7 = vmax.f32 %v2235_v33, 0.0  ;;  %3769 = vmatpush3.bf16.msra.mxu0 %v4967_v37 }
 0x1d6   : > { %3770 = vmatprep.subr.bf16.mxu0 %v4969_v13 }
 0x1d7   : > { %v2464_v10 = vmax.f32 %v2237_v54, 0.0  ;;  %v2471_v12 = vpack.c.bf16 %v2463_v7, %v2459_v11 }
 0x1d9   : > { %v2472_v34 = vpack.c.bf16 %v2464_v10, %v2460_v35  ;;  %3771 = vmatpush3.bf16.msra.mxu0 %v4972_v14 }
 0x1da   : > { %3772 = vmatprep.subr.bf16.mxu0 %v4975_v15 }
 0x1db   : > { %2913 = vmatprep.mubr.bf16.mxu0 %v2472_v34 }
 0x1dc   : > { %2914 = vmatmul.mubr.bf16.gmra.mxu0 %v2471_v12 }
 0x1dd   : > { %3773 = vmatpush3.bf16.msra.mxu0 %v4978_v51 }
 0x1de   : > { %3774 = vmatprep.subr.bf16.mxu0 %v4981_v17 }
 0x1e1   : > { %3775 = vmatpush3.bf16.msra.mxu0 %v4984_v20 }
 0x1e2   : > { %3776 = vmatprep.subr.bf16.mxu0 %v4987_v21 }
 0x1e5   : > { %3777 = vmatpush3.bf16.msra.mxu0 %v4990_v25 }
 0x204   : > { %v2273_v16 = vpop.f32.mrf.mxu0 }
 0x205   : > { %v2326_v49 = vpop.f32.mrf.mxu1  ;;  %v2274_v46 = vadd.f32 %v2273_v16, %v658_v40 }
 0x206   : > { %v2275_v18 = vpop.f32.mrf.mxu0 }
 0x207   : > { %v2328_v19 = vpop.f32.mrf.mxu1  ;;  %v2276_v45 = vadd.f32 %v2275_v18, %v662_v39  ;;  %v2327_v62 = vadd.f32 %v2326_v49, %v2274_v46 }
 0x208   : > { %v2277_v22 = vpop.f32.mrf.mxu0 }
 0x209   : > { %v2330_v24 = vpop.f32.mrf.mxu1  ;;  %v2278_v52 = vadd.f32 %v2277_v22, %v658_v40  ;;  %v2329_v59 = vadd.f32 %v2328_v19, %v2276_v45 }
 0x20a   : > { %v2279_v26 = vpop.f32.mrf.mxu0 }
 0x20b   : > { %v2332_v27 = vpop.f32.mrf.mxu1  ;;  %v2280_v60 = vadd.f32 %v2279_v26, %v662_v39  ;;  %v2331_v4 = vadd.f32 %v2330_v24, %v2278_v52 }
 0x20c   : > { %v2283_v28 = vpop.f32.mrf.mxu0 }
 0x20d   : > { %v2336_v23 = vpop.f32.mrf.mxu1  ;;  %v2333_v2 = vadd.f32 %v2332_v27, %v2280_v60  ;;  %v2284_v61 = vadd.f32 %v2283_v28, %v658_v40 }
 0x20e   : > { %v2285_v31 = vpop.f32.mrf.mxu0 }
 0x20f   : > { %v2338_v38 = vpop.f32.mrf.mxu1  ;;  %v2286_v36 = vadd.f32 %v2285_v31, %v662_v39  ;;  %v2337_v48 = vadd.f32 %v2336_v23, %v2284_v61 }
 0x210   : > { %v2287_v41 = vpop.f32.mrf.mxu0 }
 0x211   : > { %v2340_v44 = vpop.f32.mrf.mxu1  ;;  %v2288_v55 = vadd.f32 %v2287_v41, %v658_v40  ;;  %v2339_v11 = vadd.f32 %v2338_v38, %v2286_v36 }
 0x212   : > { %v2289_v47 = vpop.f32.mrf.mxu0 }
 0x213   : > { %v2342_v50 = vpop.f32.mrf.mxu1  ;;  %v2290_v34 = vadd.f32 %v2289_v47, %v662_v39  ;;  %v2341_v19 = vadd.f32 %v2340_v44, %v2288_v55 }
 0x215   : > { %v2343_v31 = vadd.f32 %v2342_v50, %v2290_v34 }
 0x244   : > { %v2379_v56 = vpop.f32.mrf.mxu0 }
 0x245   : > { %v2432_v57 = vpop.f32.mrf.mxu1  ;;  %v2380_v8 = vadd.f32 %v2379_v56, %v2327_v62 }
 0x246   : > { %v2381_v63 = vpop.f32.mrf.mxu0 }
 0x247   : > { %v2434_v0 = vpop.f32.mrf.mxu1  ;;  %v2382_v6 = vadd.f32 %v2381_v63, %v2329_v59  ;;  %v2433_v7 = vadd.f32 %v2432_v57, %v2380_v8 }
 0x248   : > { %v2383_v5 = vpop.f32.mrf.mxu0 }
 0x249   : > { %v2436_v32 = vpop.f32.mrf.mxu1  ;;  %v2384_v53 = vadd.f32 %v2383_v5, %v2331_v4  ;;  %v2435_v33 = vadd.f32 %v2434_v0, %v2382_v6  ;;  %v2453_v27 = vmax.f32 %v2433_v7, 0.0  ;;  %v2539_v0 = vld [vmem:[%s5083_s4] sm:$0x3] }
 0x24a   : > { %v2385_v43 = vpop.f32.mrf.mxu0  ;;  %v2548_v6 = vrot.slane %v2539_v0, %v653_v1  ;;  %v2544_v8 = vrot.slane %v2539_v0, %v649_v3 }
 0x24b   : > { %v2438_v9 = vpop.f32.mrf.mxu1  ;;  %v2437_v42 = vadd.f32 %v2436_v32, %v2384_v53  ;;  %v2386_v54 = vadd.f32 %v2385_v43, %v2333_v2  ;;  %v2454_v22 = vmax.f32 %v2435_v33, 0.0 }
 0x24c   : > { %v2389_v35 = vpop.f32.mrf.mxu0 }
 0x24d   : > { %v2442_v10 = vpop.f32.mrf.mxu1  ;;  %v2439_v12 = vadd.f32 %v2438_v9, %v2386_v54  ;;  %v2457_v16 = vmax.f32 %v2437_v42, 0.0  ;;  %v2390_v28 = vadd.f32 %v2389_v35, %v2337_v48 }
 0x24e   : > { %v2391_v49 = vpop.f32.mrf.mxu0 }
 0x24f   : > { %v2444_v18 = vpop.f32.mrf.mxu1  ;;  %v2458_v24 = vmax.f32 %v2439_v12, 0.0  ;;  %v2392_v26 = vadd.f32 %v2391_v49, %v2339_v11  ;;  %v2469_v45 = vpack.c.bf16 %v2457_v16, %v2453_v27  ;;  %v2443_v23 = vadd.f32 %v2442_v10, %v2390_v28 }
 0x250   : > { %v2393_v29 = vpop.f32.mrf.mxu0 }
 0x251   : > { %v2446_v30 = vpop.f32.mrf.mxu1  ;;  %v2470_v40 = vpack.c.bf16 %v2458_v24, %v2454_v22  ;;  %v2394_v41 = vadd.f32 %v2393_v29, %v2341_v19  ;;  %v2445_v38 = vadd.f32 %v2444_v18, %v2392_v26  ;;  %v2461_v50 = vmax.f32 %v2443_v23, 0.0  ;;  %v3719_v23 = vld [vmem:[%s5085_s6] ss:$0 sm:$0xff] }
 0x252   : > { %v2395_v46 = vpop.f32.mrf.mxu0 }
 0x253   : > { %v2447_v39 = vadd.f32 %v2446_v30, %v2394_v41  ;;  %v2396_v47 = vadd.f32 %v2395_v46, %v2343_v31  ;;  %2956 = vmatprep.mubr.bf16.mxu1 %v2470_v40  ;;  %v2448_v52 = vpop.f32.mrf.mxu1  ;;  %v2462_v57 = vmax.f32 %v2445_v38, 0.0 }
 0x254   : > { %2957 = vmatmul.mubr.bf16.vlgmr.msra.gmra.mxu1 %v2469_v45 }
 0x255   : > { %v2449_v44 = vadd.f32 %v2448_v52, %v2396_v47  ;;  %3804 = vmatpush3.bf16.msra.mxu1 %v4967_v37  ;;  %v2465_v56 = vmax.f32 %v2447_v39, 0.0  ;;  %v4392_v37 = vld [vmem:[#allocation10 + $0x50] sm:$0xff]  }
 0x256   : > { %3797 = vmatprep.subr.bf16.mxu1 %v4969_v13  ;;  %v4393_v13 = vld [vmem:[#allocation10 + $0x10] sm:$0xff]   ;;  %3778 = vmatprep.subr.bf16.mxu0 %v4392_v37 }
 0x257   : > { %v2466_v59 = vmax.f32 %v2449_v44, 0.0  ;;  %v2473_v62 = vpack.c.bf16 %v2465_v56, %v2461_v50  ;;  %3779 = vmatpush3.bf16.msra.mxu0 %v4393_v13 }
 0x259   : > { %v2474_v60 = vpack.c.bf16 %v2466_v59, %v2462_v57  ;;  %3805 = vmatpush3.bf16.msra.mxu1 %v4972_v14  ;;  %v4394_v14 = vld [vmem:[#allocation10 + $0x48] sm:$0xff]  }
 0x25a   : > { %3798 = vmatprep.subr.bf16.mxu1 %v4975_v15  ;;  %v4395_v15 = vld [vmem:[#allocation10 + $0x8] sm:$0xff]   ;;  %3780 = vmatprep.subr.bf16.mxu0 %v4394_v14 }
 0x25b   : > { %2966 = vmatprep.mubr.bf16.mxu1 %v2474_v60  ;;  %3781 = vmatpush3.bf16.msra.mxu0 %v4395_v15 }
 0x25c   : > { %2967 = vmatmul.mubr.bf16.gmra.mxu1 %v2473_v62 }
 0x25d   : > { %3806 = vmatpush3.bf16.msra.mxu1 %v4978_v51  ;;  %v4396_v51 = vld [vmem:[#allocation10 + $0x40] sm:$0xff]  }
 0x25e   : > { %3799 = vmatprep.subr.bf16.mxu1 %v4981_v17  ;;  %v4397_v17 = vld [vmem:[#allocation10] sm:$0xff]   ;;  %3782 = vmatprep.subr.bf16.mxu0 %v4396_v51 }
 0x25f   : > { %3783 = vmatpush3.bf16.msra.mxu0 %v4397_v17 }
 0x261   : > { %3807 = vmatpush3.bf16.msra.mxu1 %v4984_v20 }
 0x262   : > { %3800 = vmatprep.subr.bf16.mxu1 %v4987_v21 }
 0x265   : > { %3808 = vmatpush3.bf16.msra.mxu1 %v4990_v25 }
 0x266   : > { %3801 = vmatprep.subr.bf16.mxu1 %v4392_v37 }
 0x269   : > { %3809 = vmatpush3.bf16.msra.mxu1 %v4393_v13 }
 0x26a   : > { %3802 = vmatprep.subr.bf16.mxu1 %v4394_v14 }
 0x26d   : > { %3810 = vmatpush3.bf16.msra.mxu1 %v4395_v15 }
 0x26e   : > { %3803 = vmatprep.subr.bf16.mxu1 %v4396_v51 }
 0x271   : > { %3811 = vmatpush3.bf16.msra.mxu1 %v4397_v17 }
 0x294   : > { %v2905_v20 = vpop.f32.mrf.mxu0 }
 0x295   : > { %v2906_v61 = vadd.f32 %v2905_v20, %v2544_v8 }
 0x296   : > { %v2907_v21 = vpop.f32.mrf.mxu0 }
 0x297   : > { %v2908_v36 = vadd.f32 %v2907_v21, %v2548_v6 }
 0x298   : > { %v2909_v25 = vpop.f32.mrf.mxu0 }
 0x299   : > { %v2910_v53 = vadd.f32 %v2909_v25, %v2544_v8 }
 0x29a   : > { %v2911_v63 = vpop.f32.mrf.mxu0 }
 0x29b   : > { %v2912_v9 = vadd.f32 %v2911_v63, %v2548_v6 }
 0x29c   : > { %v2915_v4 = vpop.f32.mrf.mxu0 }
 0x29d   : > { %v2916_v18 = vadd.f32 %v2915_v4, %v2544_v8 }
 0x29e   : > { %v2917_v32 = vpop.f32.mrf.mxu0 }
 0x29f   : > { %v2918_v48 = vadd.f32 %v2917_v32, %v2548_v6 }
 0x2a0   : > { %v2919_v42 = vpop.f32.mrf.mxu0 }
 0x2a1   : > { %v2920_v16 = vadd.f32 %v2919_v42, %v2544_v8 }
 0x2a2   : > { %v2921_v58 = vpop.f32.mrf.mxu0 }
 0x2a3   : > { %v2922_v24 = vadd.f32 %v2921_v58, %v2548_v6 }
 0x314   : > { %v2958_v5 = vpop.f32.mrf.mxu1 }
 0x315   : > { %v2959_v54 = vadd.f32 %v2958_v5, %v2906_v61 }
 0x316   : > { %v2960_v2 = vpop.f32.mrf.mxu1 }
 0x317   : > { %v2961_v55 = vadd.f32 %v2960_v2, %v2908_v36  ;;  %v2977_v3 = vmax.f32 %v2959_v54, 0.0 }
 0x318   : > { %v2962_v43 = vpop.f32.mrf.mxu1 }
 0x319   : > { %v2963_v33 = vadd.f32 %v2962_v43, %v2910_v53  ;;  %v2978_v1 = vmax.f32 %v2961_v55, 0.0 }
 0x31a   : > { %v2964_v7 = vpop.f32.mrf.mxu1 }
 0x31b   : > { %v2965_v35 = vadd.f32 %v2964_v7, %v2912_v9  ;;  %v2979_v10 = vmax.f32 %v2963_v33, 0.0 }
 0x31c   : > { %v2968_v11 = vpop.f32.mrf.mxu1 }
 0x31d   : > { %v2980_v34 = vmax.f32 %v2965_v35, 0.0  ;;  %v2985_v19 = vpack.c.bf16 %v2979_v10, %v2977_v3  ;;  %v2969_v28 = vadd.f32 %v2968_v11, %v2916_v18 }
 0x31e   : > { %v2970_v12 = vpop.f32.mrf.mxu1 }
 0x31f   : > { %v2986_v49 = vpack.c.bf16 %v2980_v34, %v2978_v1  ;;  %v2971_v26 = vadd.f32 %v2970_v12, %v2918_v48  ;;  %v2981_v45 = vmax.f32 %v2969_v28, 0.0 }
 0x320   : > { %v2972_v22 = vpop.f32.mrf.mxu1 }
 0x321   : > { %v2973_v27 = vadd.f32 %v2972_v22, %v2920_v16  ;;  %3156 = vmatprep.mubr.bf16.mxu0 %v2986_v49  ;;  %v2982_v40 = vmax.f32 %v2971_v26, 0.0 }
 0x322   : > { %v2974_v29 = vpop.f32.mrf.mxu1  ;;  %3157 = vmatmul.mubr.bf16.vlgmr.msra.gmra.mxu0 %v2985_v19 }
 0x323   : > { %v2975_v30 = vadd.f32 %v2974_v29, %v2922_v24  ;;  %v2983_v31 = vmax.f32 %v2973_v27, 0.0 }
 0x325   : > { %v2984_v41 = vmax.f32 %v2975_v30, 0.0  ;;  %v2987_v38 = vpack.c.bf16 %v2983_v31, %v2981_v45 }
 0x327   : > { %v2988_v46 = vpack.c.bf16 %v2984_v41, %v2982_v40 }
 0x329   : > { %3164 = vmatprep.mubr.bf16.mxu1 %v2988_v46 }
 0x32a   : > { %3165 = vmatmul.mubr.bf16.vlgmr.msra.gmra.mxu1 %v2987_v38 }
 0x3e2   : > { %v3784_v39 = vpop.f32.mrf.mxu0 }
 0x3e4   : > { %v3785_v47 = vpop.f32.mrf.mxu0 }
 0x3e5   : > { %v3786_v52 = vadd.f32 %v3785_v47, %v3784_v39 }
 0x3e6   : > { %v3787_v44 = vpop.f32.mrf.mxu0 }
 0x3e7   : > { %v3159_v56 = vadd.f32 %v3786_v52, %v3719_v23 }
 0x3e8   : > { %v3788_v57 = vpop.f32.mrf.mxu0 }
 0x3e9   : > { %v3789_v59 = vadd.f32 %v3788_v57, %v3787_v44  ;;  %3173 = vmax.xlane.f32.xlu0 %v3159_v56 }
 0x3ea   : > { %v3790_v50 = vpop.f32.mrf.mxu1 }
 0x3eb   : > { %v3162_v60 = vadd.f32 %v3789_v59, %v3719_v23 }
 0x3ec   : > { %v3791_v62 = vpop.f32.mrf.mxu1 }
 0x3ed   : > { %v3792_v37 = vadd.f32 %v3791_v62, %v3790_v50  ;;  %3175 = vmax.xlane.f32.xlu0 %v3162_v60 }
 0x3ee   : > { %v3793_v13 = vpop.f32.mrf.mxu1 }
 0x3ef   : > { %v3167_v14 = vadd.f32 %v3792_v37, %v3719_v23 }
 0x3f0   : > { %v3794_v15 = vpop.f32.mrf.mxu1 }
 0x3f1   : > { %v3795_v51 = vadd.f32 %v3794_v15, %v3793_v13  ;;  %3177 = vmax.xlane.f32.xlu1 %v3167_v14 }
 0x3f3   : > { %v3170_v17 = vadd.f32 %v3795_v51, %v3719_v23 }
 0x3f5   : > { %3179 = vmax.xlane.f32.xlu1 %v3170_v17 }
 0x472   : > { %v3174_v20 = vpop.xlane.xlu0 %3173 }
 0x473   : > { %v3181_v21 = vsub.f32 %v3159_v56, %v3174_v20 }
 0x475   : > { %v3185_v25 = vmul.f32 1.442695, %v3181_v21 }
 0x476   : > { %v3176_v63 = vpop.xlane.xlu0 %3175 }
 0x477   : > { %4398 = vpow2.f32 %v3185_v25  ;;  %v3182_v0 = vsub.f32 %v3162_v60, %v3176_v63 }
 0x479   : > { %v3187_v4 = vmul.f32 1.442695, %v3182_v0 }
 0x47a   : > { %v3178_v6 = vpop.xlane.xlu1 %3177 }
 0x47b   : > { %4400 = vpow2.f32 %v3187_v4  ;;  %v3183_v8 = vsub.f32 %v3167_v14, %v3178_v6 }
 0x47d   : > { %v3189_v5 = vmul.f32 1.442695, %v3183_v8 }
 0x47e   : > { %v3180_v32 = vpop.xlane.xlu1 %3179 }
 0x47f   : > { %4402 = vpow2.f32 %v3189_v5  ;;  %v3184_v2 = vsub.f32 %v3170_v17, %v3180_v32 }
 0x481   : > { %v3191_v36 = vmul.f32 1.442695, %v3184_v2 }
 0x483   : > { %4404 = vpow2.f32 %v3191_v36 }
 0x484   : > { %v4399_v53 = vpop.eup %4398 }
 0x485   : > { %3193 = vadd.xlane.f32.xlu0 %v4399_v53 }
 0x488   : > { %v4401_v61 = vpop.eup %4400 }
 0x489   : > { %3195 = vadd.xlane.f32.xlu1 %v4401_v61 }
 0x48c   : > { %v4403_v43 = vpop.eup %4402 }
 0x48d   : > { %3197 = vadd.xlane.f32.xlu0 %v4403_v43 }
 0x490   : > { %v4405_v9 = vpop.eup %4404 }
 0x491   : > { %3199 = vadd.xlane.f32.xlu1 %v4405_v9 }
 0x50e   : > { %v3194_v55 = vpop.xlane.xlu0 %3193 }
 0x50f   : > { %4406 = vrcp.f32 %v3194_v55 }
 0x512   : > { %v3196_v33 = vpop.xlane.xlu1 %3195 }
 0x513   : > { %4408 = vrcp.f32 %v3196_v33 }
 0x516   : > { %v3198_v42 = vpop.xlane.xlu0 %3197 }
 0x517   : > { %4410 = vrcp.f32 %v3198_v42 }
 0x51a   : > { %v3200_v54 = vpop.xlane.xlu1 %3199 }
 0x51b   : > { %4412 = vrcp.f32 %v3200_v54 }
 0x51c   : > { %v4407_v7 = vpop.eup %4406 }
 0x51d   : > { %v3205_v10 = vmul.f32 %v4407_v7, %v4399_v53 }
 0x520   : > { %v4409_v35 = vpop.eup %4408 }
 0x521   : > { %v3206_v11 = vmul.f32 %v4409_v35, %v4401_v61 }
 0x523   : > { %v3760_v1 = vpack.c.bf16 %v3206_v11, %v3205_v10 }
 0x524   : > { %v4411_v34 = vpop.eup %4410 }
 0x525   : > { %3761 = vst [vmem:[%s360_s17] sm:$0xff] %v3760_v1   ;;  %v3207_v3 = vmul.f32 %v4411_v34, %v4403_v43 }
 0x528   : > { %v4413_v58 = vpop.eup %4412 }
 0x529   : > { %v3208_v12 = vmul.f32 %v4413_v58, %v4405_v9  ;;  %3236 = sbr.rel (!%p5105_p12) target bundleno = 1353 (0x549), region = 72 }
 0x52b   : > { %v3765_v48 = vpack.c.bf16 %v3208_v12, %v3207_v3 }
 0x52d   : > { %3767 = vst [vmem:[%s360_s17 + $0x8] sm:$0xff] %v3765_v48  }
 0x52e   : > { %s5115_s16 = smov (!%p3239_p4, %s3238_s16), 4 }
 0x52f   : > { %s5022_s19 = sshll.u32 %s5115_s16, 6 }
 0x530   : > { %s3243_s1 = ssub.s32 256, %s5022_s19 }
 0x531   : > { %3244 = vsyncadd %s3230_s9, %s3243_s1  ;;  %p3743_p6 = scmp.ne.s32.totalorder %s5022_s19, 0  ;;  %s3756_s22 = sshll.u32 %s4695_s28, 8 }
 0x532   : > { %s5032_s10 = scalar_lea.hbm %s5086_s7, %s3756_s22  ;;  %s3249_s29 = sshll.u32 %s360_s17, 4  ;;  %s5034_s29 = int_to_ptr.vmem [resolvable:$true] %s3249_s29 }
 0x533   : > { %s4544_s12 = scalar_lea.vmem %s5034_s29, %s5022_s19  ;;  %s4631_s15 = smov [#allocation11]  }
 0x534   : > { %p4545_p8 = scmp.ne.s32.totalorder %s5034_s29, %s4544_s12  ;;  %s4548_s18 = sshll.u32 %s4631_s15, 4  ;;  %s4549_s18 = int_to_ptr.vmem [resolvable:$false] %s4548_s18 }
 0x535   : > { %s4550_s28 = scalar_lea.vmem %s4549_s18, 512  ;;  %p4551_p0 = scmp.lt.s32.totalorder %s5034_s29, %s4549_s18 }
 0x536   : > { %p4546_p13 = pnand %p4545_p8, %p3743_p6  ;;  %p4552_p10 = scmp.lt.s32.totalorder %s4550_s28, %s4544_s12 }
 0x538   : > { %p4547_p2 = pneg %p4546_p13  ;;  %p4553_p1 = por %p4552_p10, %p4551_p0 }
 0x53a   : > { %p4554_p5 = pnand %p4553_p1, %p4547_p2 }
 0x53c   : > { %4557 = shalt.err (!%p4554_p5)
}
 0x53d   : > { %s4558_s20 = scalar_lea.hbm %s5032_s10, %s5022_s19  ;;  %s4562_s11 = scalar_lea.hbm %s5086_s7, 320 }
 0x53e   : > { %p4559_p3 = scmp.ne.s32.totalorder %s5032_s10, %s4558_s20  ;;  %p4563_p12 = scmp.lt.s32.totalorder %s5032_s10, %s5086_s7 }
 0x53f   : > { %p4564_p4 = scmp.lt.s32.totalorder %s4562_s11, %s4558_s20 }
 0x540   : > { %p4560_p7 = pnand %p4559_p3, %p3743_p6 }
 0x541   : > { %p4565_p8 = por %p4564_p4, %p4563_p12 }
 0x542   : > { %p4561_p9 = pneg %p4560_p7 }
 0x544   : > { %p4566_p13 = pnand %p4565_p8, %p4561_p9 }
 0x546   : > { %4569 = shalt.err (!%p4566_p13)
}
 0x547   : > { %s4632_s22 = smov 64   ;;  %s4633_s13 = smov 4  }
 0x548   : > { %3255 = dma.vmem_to_hbm [thread:$0]  (%p3743_p6), %s5034_s29, %s5022_s19, %s5032_s10, %s3230_s9, %s4632_s22, %s4632_s22, %s4633_s13  }
 0x549 PF: > { %s3264_s8 = sand.u32 1, %s4604_s24   ;;  %p5106_p2 = scmp.ne.s32.totalorder %s5095_s14, 0 }
 0x54a   : > { %s3265_s12 = scalar_lea.sflag [#allocation4], %s3264_s8 }
 0x54b   : > { %p3844_p0 = pnand %p3366_p11, %p5106_p2 }
 0x54d   : > { %p3845_p10 = pneg %p3844_p0 }
 0x54f   : > { %4599 = dma.done.wait (%p3845_p10), %s3265_s12, 256  }
 0x550   : > { %4601 = vsyncadd (%p3845_p10), %s3265_s12, 4294967040  ;;  %s5107_s15 = sld [smem:[#allocation16_spill]]  ;;  %p22_p1 = scmp.ge.s32.totalorder %s4699_s30, 4  }
 0x551   : > { %s5108_s24 = smov %s4608_s25  ;;  %s5109_s25 = smov %s4612_s26 }
 0x552   : > { %s5111_s27 = smov %s4699_s30  ;;  %24 = sbr.rel (!%p22_p1) target bundleno = 9 (0x9), region = 109 }
 0x556   : > { %s5110_s26 = smov %s5107_s15 }
 0x557   :  { %3270 = vsyncpa [#allocation3], 1 }
 0x558   :  { %3272 = vsyncpa [#allocation3 + $0x1], 1 }
 0x559   :  { %3273 = vsyncpa [#allocation6], 1 }
 0x55a   :  { %3274 = vsyncpa [#allocation9], 1 }
 0x55b   :  { %3275 = vsyncpa [#allocation4], 1 }
 0x55c   :  { %3277 = vsyncpa [#allocation4 + $0x1], 1 }

</bundles_post_ra>
